<compile_context>
chip_gen: v7x
topology: tpu7x:2x2x1
jax: 0.10.0
libtpu: 0.0.40
codegen_flags: <defaults>
</compile_context>

<pallas_src>
import functools
import math

import jax
import jax.numpy as jnp
from jax.experimental import pallas as pl
from jax.experimental.pallas import tpu as pltpu


# --------------------------------- the kernel --------------------------------

def _lrelu(x):
    # LeakyReLU(0.2): max(x, 0.2x)
    return jnp.maximum(x, 0.2 * x)


def aecoder_kernel(x_ref,
                   e1, e2, e3, e4, e5, d1, d2, d3, d4, d5,
                   o_ref, *, L):
    x = x_ref[0]                      # (2, Lp) f32 : channels on sublanes, length on lanes
    Lp = x.shape[-1]

    # ---- hoisted lane iotas & masks ------------------------------------------------
    # Memoized at trace time: each iota / compare is emitted once and reused by every
    # layer (JAX does not CSE broadcast_in_dim, so without this every shift/upsample
    # call re-materializes a full (C, Lp) iota + compare on the VPU-bound path).
    _iota, _keep_prev, _keep_next, _odd = {}, {}, {}, {}

    def lanes(c):
        if c not in _iota:
            _iota[c] = jax.lax.broadcasted_iota(jnp.int32, (c, Lp), 1)
        return _iota[c]

    def keep_prev(c, d):              # True where the (j - d) neighbour exists
        k = (c, d)
        if k not in _keep_prev:
            _keep_prev[k] = lanes(c) >= d
        return _keep_prev[k]

    def keep_next(c, d):              # True where the (j + d) neighbour exists
        k = (c, d)
        if k not in _keep_next:
            _keep_next[k] = lanes(c) < (L - d)
        return _keep_next[k]

    def odd_bit(c, d):                # True where lane index has bit log2(d) set
        k = (c, d)
        if k not in _odd:
            _odd[k] = (lanes(c) & d) != 0
        return _odd[k]

    # ---- layer helpers ---------------------------------------------------------------
    def shift_prev(a, d):             # out[:, j] = a[:, j-d], zero where j < d
        return jnp.where(keep_prev(a.shape[0], d), pltpu.roll(a, d, 1), 0.0)

    def shift_next(a, d):             # out[:, j] = a[:, j+d], zero where j >= L-d
        return jnp.where(keep_next(a.shape[0], d), pltpu.roll(a, Lp - d, 1), 0.0)

    def mm(w, a):                     # (Cout, Cin) @ (Cin, Lp) -> (Cout, Lp), lane-dense
        return jnp.dot(w, a, preferred_element_type=jnp.float32)

    def conv3(a, w_ref, d):           # Conv1d(k=3, s=1, p=1, bias=False) at dilation d
        return (mm(w_ref[1], a)
                + mm(w_ref[0], shift_prev(a, d))
                + mm(w_ref[2], shift_next(a, d)))

    def pool(a, d):
        # AvgPool1d(2) with the /2 folded into the next conv's weights host-side.
        # NOTE: lanes j >= Lp-d receive wrapped garbage; they are never a multiple of
        # any later dilation >= 2d within the valid range, so no downstream valid lane
        # ever reads them (invariant of the a-trous layer stack).
        return a + pltpu.roll(a, Lp - d, 1)

    def upsample(a, d):               # nearest x2: dilation 2d -> d
        return jnp.where(odd_bit(a.shape[0], d), pltpu.roll(a, d, 1), a)

    # -------------------------------- Encoder --------------------------------
    h = _lrelu(conv3(x, e1, 1));  h = pool(h, 1)
    h = _lrelu(conv3(h, e2, 2));  h = pool(h, 2)
    h = _lrelu(conv3(h, e3, 4));  h = pool(h, 4)
    h = _lrelu(conv3(h, e4, 8));  h = pool(h, 8)
    # conv5: Conv1d(k=2, s=1, p=0) at dilation 16 -> latent length L/16 - 1
    z = mm(e5[0], h) + mm(e5[1], shift_next(h, 16))
    z = jnp.where(keep_next(z.shape[0], 16), z, 0.0)   # emulate the shorter 'valid' output

    # -------------------------------- Decoder --------------------------------
    # conv1: ConvTranspose1d(k=2, s=1, p=0) at dilation 16 -> length L/16
    h = _lrelu(mm(d1[0], z) + mm(d1[1], shift_prev(z, 16)))
    h = upsample(h, 8)
    h = _lrelu(conv3(h, d2, 8));  h = upsample(h, 4)
    h = _lrelu(conv3(h, d3, 4));  h = upsample(h, 2)
    h = _lrelu(conv3(h, d4, 2));  h = upsample(h, 1)
    y = jnp.tanh(conv3(h, d5, 1))

    o_ref[0] = y.astype(o_ref.dtype)              # (2, Lp) lane-dense store


# ------------------------------- host-side glue -------------------------------

def init_params(key, ndf, ngf):
    """Deterministic weights, PyTorch default (kaiming-uniform, a=sqrt(5)) bounds.

    Every weight is pre-packed for the kernel as (K, Cout, Cin).
    """
    def conv_w(k, cout, cin, ks):                 # nn.Conv1d weight (Cout, Cin, K)
        bound = 1.0 / math.sqrt(cin * ks)
        w = jax.random.uniform(k, (cout, cin, ks), jnp.float32, -bound, bound)
        return jnp.transpose(w, (2, 0, 1))        # (K, Cout, Cin)

    def convT_w(k, cin, cout, ks):                # nn.ConvTranspose1d weight (Cin, Cout, K)
        bound = 1.0 / math.sqrt(cout * ks)
        w = jax.random.uniform(k, (cin, cout, ks), jnp.float32, -bound, bound)
        return jnp.transpose(w, (2, 1, 0))        # (K, Cout, Cin)

    ks = jax.random.split(key, 10)
    embed = ndf * 4
    return (
        # Encoder
        conv_w(ks[0], ndf,     2,       3),
        conv_w(ks[1], ndf,     ndf,     3),
        conv_w(ks[2], ndf * 2, ndf,     3),
        conv_w(ks[3], ndf * 2, ndf * 2, 3),
        conv_w(ks[4], ndf * 4, ndf * 2, 2),
        # Decoder
        convT_w(ks[5], embed,  ngf * 2, 2),
        conv_w(ks[6], ngf * 2, ngf * 2, 3),
        conv_w(ks[7], ngf,     ngf * 2, 3),
        conv_w(ks[8], ngf,     ngf,     3),
        conv_w(ks[9], 2,       ngf,     3),
    )


@jax.jit
def aecoder_forward(x_ncw, params):
    """x_ncw: (B, 2, L) float32 (PyTorch NCW).  Returns (B, 2, L) float32."""
    B, C, L = x_ncw.shape
    assert C == 2, "input must have 2 channels"
    assert L % 16 == 0 and L >= 32, "length must be a multiple of 16 and >= 32"

    Lp = max(128, pl.cdiv(L, 128) * 128)          # lane-align the length axis
    x = jnp.pad(x_ncw, ((0, 0), (0, 0), (0, Lp - L)))

    # Fold the AvgPool1d /2 into the conv that consumes each pool output
    # (pool feeds a bias-free linear conv, so this is exact).
    e1, e2, e3, e4, e5, d1, d2, d3, d4, d5 = params
    kparams = (e1, e2 * 0.5, e3 * 0.5, e4 * 0.5, e5 * 0.5, d1, d2, d3, d4, d5)

    wsize = sum(int(w.size) for w in params)
    cost = pl.CostEstimate(
        flops=2 * B * Lp * wsize,                 # a-trous: every layer runs at Lp lanes
        transcendentals=2 * B * Lp,               # final tanh
        bytes_accessed=4 * (int(x.size) + B * 2 * Lp + wsize),
    )

    # VMEM budget derived from Lp: peak live (C, Lp) rows (acts + shifted taps +
    # hoisted iotas/masks) ~< 512, plus weights and a margin; clamp to a v7x-safe cap.
    vmem_limit = 4 * wsize + 4 * 512 * Lp + (2 << 20)
    vmem_limit = int(min(max(vmem_limit, 16 * 1024 * 1024), 48 * 1024 * 1024))

    wspec = pl.BlockSpec(memory_space=pltpu.MemorySpace.VMEM)   # small weights, whole in VMEM
    y = pl.pallas_call(
        functools.partial(aecoder_kernel, L=L),
        out_shape=jax.ShapeDtypeStruct((B, 2, Lp), jnp.float32),
        grid=(B,),                                # one sample per grid step, pipelined DMA
        in_specs=[pl.BlockSpec((1, 2, Lp), lambda b: (b, 0, 0))] + [wspec] * 10,
        out_specs=pl.BlockSpec((1, 2, Lp), lambda b: (b, 0, 0)),
        compiler_params=pltpu.CompilerParams(
            dimension_semantics=("parallel",),    # shard batch across both TCs on v7x
            vmem_limit_bytes=vmem_limit,
        ),
        cost_estimate=cost,
    )(x, *kparams)

    return y[:, :, :L]                            # drop the lane padding


# ----------------------- pure-JAX reference (PyTorch semantics) ----------------------

def _ref_forward(x_ncw, params):
    e1, e2, e3, e4, e5, d1, d2, d3, d4, d5 = params
    hi = jax.lax.Precision.HIGHEST

    def mix(w, x):                                # (Cout, Cin) x (B, Cin, L) -> (B, Cout, L)
        return jnp.einsum('oc,bcl->bol', w, x, precision=hi)

    def conv3(x, w):                              # Conv1d(k=3, s=1, p=1)
        xp = jnp.pad(x, ((0, 0), (0, 0), (1, 1)))
        return mix(w[0], xp[:, :, :-2]) + mix(w[1], xp[:, :, 1:-1]) + mix(w[2], xp[:, :, 2:])

    def conv2_valid(x, w):                        # Conv1d(k=2, s=1, p=0)
        return mix(w[0], x[:, :, :-1]) + mix(w[1], x[:, :, 1:])

    def convT2(x, w):                             # ConvTranspose1d(k=2, s=1, p=0)
        a, b = mix(w[0], x), mix(w[1], x)
        return jnp.pad(a, ((0, 0), (0, 0), (0, 1))) + jnp.pad(b, ((0, 0), (0, 0), (1, 0)))

    def pool(x):
        B_, C_, L_ = x.shape
        return x.reshape(B_, C_, L_ // 2, 2).mean(-1)

    def up(x):
        return jnp.repeat(x, 2, axis=-1)

    lrelu = lambda v: jnp.maximum(v, 0.2 * v)
    h = lrelu(conv3(x_ncw, e1)); h = pool(h)
    h = lrelu(conv3(h, e2));     h = pool(h)
    h = lrelu(conv3(h, e3));     h = pool(h)
    h = lrelu(conv3(h, e4));     h = pool(h)
    z = conv2_valid(h, e5)
    h = lrelu(convT2(z, d1));    h = up(h)
    h = lrelu(conv3(h, d2));     h = up(h)
    h = lrelu(conv3(h, d3));     h = up(h)
    h = lrelu(conv3(h, d4));     h = up(h)
    return jnp.tanh(conv3(h, d5))


if __name__ == "__main__":
    key = jax.random.PRNGKey(0)
    kx, kw = jax.random.split(key)

    ndf, ngf = 8, 8
    params = init_params(kw, ndf, ngf)

    # L=32: small, heavily padded.  L=128: L == Lp (no padding slack, roll wrap-around).
    # L=256: multi-vreg lane rolls.  All checked against the pure-JAX reference.
    for (B, L) in [(2, 32), (2, 128), (1, 256)]:
        kx, sub = jax.random.split(kx)
        x = jax.random.normal(sub, (B, 2, L), jnp.float32)

        y = aecoder_forward(x, params)
        jax.block_until_ready(y)

        assert y.shape == (B, 2, L), (y.shape, B, L)
        assert bool(jnp.all(jnp.isfinite(y)))
        assert bool(jnp.all(jnp.abs(y) <= 1.0))   # tanh output range

        y_ref = _ref_forward(x, params)
        err = float(jnp.max(jnp.abs(y - y_ref)))
        assert err < 5e-3, f"L={L}: mismatch vs reference: {err}"

    print("KERNEL_OK")
</pallas_src>

<mosaic_0001>
module attributes {stable_mosaic.version = 11 : i64} {
  func.func @aecoder_kernel(%arg0: i32, %arg1: memref<1x2x128xf32, #tpu.memory_space<vmem>>, %arg2: memref<3x8x2xf32, #tpu.memory_space<vmem>>, %arg3: memref<3x8x8xf32, #tpu.memory_space<vmem>>, %arg4: memref<3x16x8xf32, #tpu.memory_space<vmem>>, %arg5: memref<3x16x16xf32, #tpu.memory_space<vmem>>, %arg6: memref<2x32x16xf32, #tpu.memory_space<vmem>>, %arg7: memref<2x16x32xf32, #tpu.memory_space<vmem>>, %arg8: memref<3x16x16xf32, #tpu.memory_space<vmem>>, %arg9: memref<3x8x16xf32, #tpu.memory_space<vmem>>, %arg10: memref<3x8x8xf32, #tpu.memory_space<vmem>>, %arg11: memref<3x2x8xf32, #tpu.memory_space<vmem>>, %arg12: memref<1x2x128xf32, #tpu.memory_space<vmem>>) attributes {dimension_semantics = [#tpu.dimension_semantics<parallel>], iteration_bounds = array<i64: 2>, scalar_prefetch = 0 : i64, scratch_operands = 0 : i64, tpu.core_type = #tpu.core_type<tc>, window_params = [{transform_indices = @transform_0, window_bounds = array<i64: 1, 2, 128>}, {pipeline_mode = #tpu.pipeline_mode<synchronous>, transform_indices = @transform_1, window_bounds = array<i64: 3, 8, 2>}, {pipeline_mode = #tpu.pipeline_mode<synchronous>, transform_indices = @transform_2, window_bounds = array<i64: 3, 8, 8>}, {pipeline_mode = #tpu.pipeline_mode<synchronous>, transform_indices = @transform_3, window_bounds = array<i64: 3, 16, 8>}, {pipeline_mode = #tpu.pipeline_mode<synchronous>, transform_indices = @transform_4, window_bounds = array<i64: 3, 16, 16>}, {pipeline_mode = #tpu.pipeline_mode<synchronous>, transform_indices = @transform_5, window_bounds = array<i64: 2, 32, 16>}, {pipeline_mode = #tpu.pipeline_mode<synchronous>, transform_indices = @transform_6, window_bounds = array<i64: 2, 16, 32>}, {pipeline_mode = #tpu.pipeline_mode<synchronous>, transform_indices = @transform_7, window_bounds = array<i64: 3, 16, 16>}, {pipeline_mode = #tpu.pipeline_mode<synchronous>, transform_indices = @transform_8, window_bounds = array<i64: 3, 8, 16>}, {pipeline_mode = #tpu.pipeline_mode<synchronous>, transform_indices = @transform_9, window_bounds = array<i64: 3, 8, 8>}, {pipeline_mode = #tpu.pipeline_mode<synchronous>, transform_indices = @transform_10, window_bounds = array<i64: 3, 2, 8>}, {transform_indices = @transform_11, window_bounds = array<i64: 1, 2, 128>}]} {
    %c0 = arith.constant 0 : index
    %c0_0 = arith.constant 0 : index
    %c0_1 = arith.constant 0 : index
    %0 = vector.load %arg1[%c0, %c0_0, %c0_1] : memref<1x2x128xf32, #tpu.memory_space<vmem>>, vector<1x2x128xf32>
    %1 = vector.shape_cast %0 : vector<1x2x128xf32> to vector<2x128xf32>
    %c1 = arith.constant 1 : index
    %c0_2 = arith.constant 0 : index
    %c0_3 = arith.constant 0 : index
    %2 = vector.load %arg2[%c1, %c0_2, %c0_3] : memref<3x8x2xf32, #tpu.memory_space<vmem>>, vector<1x8x2xf32>
    %3 = vector.shape_cast %2 : vector<1x8x2xf32> to vector<8x2xf32>
    %cst = arith.constant dense<0.000000e+00> : vector<8x128xf32>
    %4 = tpu.matmul %3, %1, %cst {dimension_numbers = #tpu.dot_dimension_numbers<[1], [0], [0], [1], [0, 0, 1, 1], [], []>} : vector<8x2xf32>, vector<2x128xf32>, vector<8x128xf32> -> vector<8x128xf32>
    %c0_4 = arith.constant 0 : index
    %c0_5 = arith.constant 0 : index
    %c0_6 = arith.constant 0 : index
    %5 = vector.load %arg2[%c0_4, %c0_5, %c0_6] : memref<3x8x2xf32, #tpu.memory_space<vmem>>, vector<1x8x2xf32>
    %6 = vector.shape_cast %5 : vector<1x8x2xf32> to vector<8x2xf32>
    %7 = tpu.iota {dimensions = array<i32: 1>} : vector<2x128xi32>
    %c1_i32 = arith.constant 1 : i32
    %8 = vector.broadcast %c1_i32 : i32 to vector<2x128xi32>
    %9 = arith.cmpi sge, %7, %8 : vector<2x128xi32>
    %c1_i32_7 = arith.constant 1 : i32
    %10 = tpu.dynamic_rotate %1 by %c1_i32_7 dim 1 : vector<2x128xf32>, i32 -> vector<2x128xf32>
    %cst_8 = arith.constant 0.000000e+00 : f32
    %11 = vector.broadcast %cst_8 : f32 to vector<2x128xf32>
    %12 = arith.select %9, %10, %11 : vector<2x128xi1>, vector<2x128xf32>
    %cst_9 = arith.constant dense<0.000000e+00> : vector<8x128xf32>
    %13 = tpu.matmul %6, %12, %cst_9 {dimension_numbers = #tpu.dot_dimension_numbers<[1], [0], [0], [1], [0, 0, 1, 1], [], []>} : vector<8x2xf32>, vector<2x128xf32>, vector<8x128xf32> -> vector<8x128xf32>
    %14 = arith.addf %4, %13 : vector<8x128xf32>
    %c2 = arith.constant 2 : index
    %c0_10 = arith.constant 0 : index
    %c0_11 = arith.constant 0 : index
    %15 = vector.load %arg2[%c2, %c0_10, %c0_11] : memref<3x8x2xf32, #tpu.memory_space<vmem>>, vector<1x8x2xf32>
    %16 = vector.shape_cast %15 : vector<1x8x2xf32> to vector<8x2xf32>
    %c31_i32 = arith.constant 31 : i32
    %17 = vector.broadcast %c31_i32 : i32 to vector<2x128xi32>
    %18 = arith.cmpi slt, %7, %17 : vector<2x128xi32>
    %c127_i32 = arith.constant 127 : i32
    %19 = tpu.dynamic_rotate %1 by %c127_i32 dim 1 : vector<2x128xf32>, i32 -> vector<2x128xf32>
    %cst_12 = arith.constant 0.000000e+00 : f32
    %20 = vector.broadcast %cst_12 : f32 to vector<2x128xf32>
    %21 = arith.select %18, %19, %20 : vector<2x128xi1>, vector<2x128xf32>
    %cst_13 = arith.constant dense<0.000000e+00> : vector<8x128xf32>
    %22 = tpu.matmul %16, %21, %cst_13 {dimension_numbers = #tpu.dot_dimension_numbers<[1], [0], [0], [1], [0, 0, 1, 1], [], []>} : vector<8x2xf32>, vector<2x128xf32>, vector<8x128xf32> -> vector<8x128xf32>
    %23 = arith.addf %14, %22 : vector<8x128xf32>
    %cst_14 = arith.constant 2.000000e-01 : f32
    %24 = vector.broadcast %cst_14 : f32 to vector<8x128xf32>
    %25 = arith.mulf %24, %23 : vector<8x128xf32>
    %26 = arith.maximumf %23, %25 : vector<8x128xf32>
    %c127_i32_15 = arith.constant 127 : i32
    %27 = tpu.dynamic_rotate %26 by %c127_i32_15 dim 1 : vector<8x128xf32>, i32 -> vector<8x128xf32>
    %28 = arith.addf %26, %27 : vector<8x128xf32>
    %c1_16 = arith.constant 1 : index
    %c0_17 = arith.constant 0 : index
    %c0_18 = arith.constant 0 : index
    %29 = vector.load %arg3[%c1_16, %c0_17, %c0_18] : memref<3x8x8xf32, #tpu.memory_space<vmem>>, vector<1x8x8xf32>
    %30 = vector.shape_cast %29 : vector<1x8x8xf32> to vector<8x8xf32>
    %cst_19 = arith.constant dense<0.000000e+00> : vector<8x128xf32>
    %31 = tpu.matmul %30, %28, %cst_19 {dimension_numbers = #tpu.dot_dimension_numbers<[1], [0], [0], [1], [0, 0, 1, 1], [], []>} : vector<8x8xf32>, vector<8x128xf32>, vector<8x128xf32> -> vector<8x128xf32>
    %c0_20 = arith.constant 0 : index
    %c0_21 = arith.constant 0 : index
    %c0_22 = arith.constant 0 : index
    %32 = vector.load %arg3[%c0_20, %c0_21, %c0_22] : memref<3x8x8xf32, #tpu.memory_space<vmem>>, vector<1x8x8xf32>
    %33 = vector.shape_cast %32 : vector<1x8x8xf32> to vector<8x8xf32>
    %34 = tpu.iota {dimensions = array<i32: 1>} : vector<8x128xi32>
    %c2_i32 = arith.constant 2 : i32
    %35 = vector.broadcast %c2_i32 : i32 to vector<8x128xi32>
    %36 = arith.cmpi sge, %34, %35 : vector<8x128xi32>
    %c2_i32_23 = arith.constant 2 : i32
    %37 = tpu.dynamic_rotate %28 by %c2_i32_23 dim 1 : vector<8x128xf32>, i32 -> vector<8x128xf32>
    %cst_24 = arith.constant 0.000000e+00 : f32
    %38 = vector.broadcast %cst_24 : f32 to vector<8x128xf32>
    %39 = arith.select %36, %37, %38 : vector<8x128xi1>, vector<8x128xf32>
    %cst_25 = arith.constant dense<0.000000e+00> : vector<8x128xf32>
    %40 = tpu.matmul %33, %39, %cst_25 {dimension_numbers = #tpu.dot_dimension_numbers<[1], [0], [0], [1], [0, 0, 1, 1], [], []>} : vector<8x8xf32>, vector<8x128xf32>, vector<8x128xf32> -> vector<8x128xf32>
    %41 = arith.addf %31, %40 : vector<8x128xf32>
    %c2_26 = arith.constant 2 : index
    %c0_27 = arith.constant 0 : index
    %c0_28 = arith.constant 0 : index
    %42 = vector.load %arg3[%c2_26, %c0_27, %c0_28] : memref<3x8x8xf32, #tpu.memory_space<vmem>>, vector<1x8x8xf32>
    %43 = vector.shape_cast %42 : vector<1x8x8xf32> to vector<8x8xf32>
    %c30_i32 = arith.constant 30 : i32
    %44 = vector.broadcast %c30_i32 : i32 to vector<8x128xi32>
    %45 = arith.cmpi slt, %34, %44 : vector<8x128xi32>
    %c126_i32 = arith.constant 126 : i32
    %46 = tpu.dynamic_rotate %28 by %c126_i32 dim 1 : vector<8x128xf32>, i32 -> vector<8x128xf32>
    %cst_29 = arith.constant 0.000000e+00 : f32
    %47 = vector.broadcast %cst_29 : f32 to vector<8x128xf32>
    %48 = arith.select %45, %46, %47 : vector<8x128xi1>, vector<8x128xf32>
    %cst_30 = arith.constant dense<0.000000e+00> : vector<8x128xf32>
    %49 = tpu.matmul %43, %48, %cst_30 {dimension_numbers = #tpu.dot_dimension_numbers<[1], [0], [0], [1], [0, 0, 1, 1], [], []>} : vector<8x8xf32>, vector<8x128xf32>, vector<8x128xf32> -> vector<8x128xf32>
    %50 = arith.addf %41, %49 : vector<8x128xf32>
    %cst_31 = arith.constant 2.000000e-01 : f32
    %51 = vector.broadcast %cst_31 : f32 to vector<8x128xf32>
    %52 = arith.mulf %51, %50 : vector<8x128xf32>
    %53 = arith.maximumf %50, %52 : vector<8x128xf32>
    %c126_i32_32 = arith.constant 126 : i32
    %54 = tpu.dynamic_rotate %53 by %c126_i32_32 dim 1 : vector<8x128xf32>, i32 -> vector<8x128xf32>
    %55 = arith.addf %53, %54 : vector<8x128xf32>
    %c1_33 = arith.constant 1 : index
    %c0_34 = arith.constant 0 : index
    %c0_35 = arith.constant 0 : index
    %56 = vector.load %arg4[%c1_33, %c0_34, %c0_35] : memref<3x16x8xf32, #tpu.memory_space<vmem>>, vector<1x16x8xf32>
    %57 = vector.shape_cast %56 : vector<1x16x8xf32> to vector<16x8xf32>
    %cst_36 = arith.constant dense<0.000000e+00> : vector<16x128xf32>
    %58 = tpu.matmul %57, %55, %cst_36 {dimension_numbers = #tpu.dot_dimension_numbers<[1], [0], [0], [1], [0, 0, 1, 1], [], []>} : vector<16x8xf32>, vector<8x128xf32>, vector<16x128xf32> -> vector<16x128xf32>
    %c0_37 = arith.constant 0 : index
    %c0_38 = arith.constant 0 : index
    %c0_39 = arith.constant 0 : index
    %59 = vector.load %arg4[%c0_37, %c0_38, %c0_39] : memref<3x16x8xf32, #tpu.memory_space<vmem>>, vector<1x16x8xf32>
    %60 = vector.shape_cast %59 : vector<1x16x8xf32> to vector<16x8xf32>
    %c4_i32 = arith.constant 4 : i32
    %61 = vector.broadcast %c4_i32 : i32 to vector<8x128xi32>
    %62 = arith.cmpi sge, %34, %61 : vector<8x128xi32>
    %c4_i32_40 = arith.constant 4 : i32
    %63 = tpu.dynamic_rotate %55 by %c4_i32_40 dim 1 : vector<8x128xf32>, i32 -> vector<8x128xf32>
    %cst_41 = arith.constant 0.000000e+00 : f32
    %64 = vector.broadcast %cst_41 : f32 to vector<8x128xf32>
    %65 = arith.select %62, %63, %64 : vector<8x128xi1>, vector<8x128xf32>
    %cst_42 = arith.constant dense<0.000000e+00> : vector<16x128xf32>
    %66 = tpu.matmul %60, %65, %cst_42 {dimension_numbers = #tpu.dot_dimension_numbers<[1], [0], [0], [1], [0, 0, 1, 1], [], []>} : vector<16x8xf32>, vector<8x128xf32>, vector<16x128xf32> -> vector<16x128xf32>
    %67 = arith.addf %58, %66 : vector<16x128xf32>
    %c2_43 = arith.constant 2 : index
    %c0_44 = arith.constant 0 : index
    %c0_45 = arith.constant 0 : index
    %68 = vector.load %arg4[%c2_43, %c0_44, %c0_45] : memref<3x16x8xf32, #tpu.memory_space<vmem>>, vector<1x16x8xf32>
    %69 = vector.shape_cast %68 : vector<1x16x8xf32> to vector<16x8xf32>
    %c28_i32 = arith.constant 28 : i32
    %70 = vector.broadcast %c28_i32 : i32 to vector<8x128xi32>
    %71 = arith.cmpi slt, %34, %70 : vector<8x128xi32>
    %c124_i32 = arith.constant 124 : i32
    %72 = tpu.dynamic_rotate %55 by %c124_i32 dim 1 : vector<8x128xf32>, i32 -> vector<8x128xf32>
    %cst_46 = arith.constant 0.000000e+00 : f32
    %73 = vector.broadcast %cst_46 : f32 to vector<8x128xf32>
    %74 = arith.select %71, %72, %73 : vector<8x128xi1>, vector<8x128xf32>
    %cst_47 = arith.constant dense<0.000000e+00> : vector<16x128xf32>
    %75 = tpu.matmul %69, %74, %cst_47 {dimension_numbers = #tpu.dot_dimension_numbers<[1], [0], [0], [1], [0, 0, 1, 1], [], []>} : vector<16x8xf32>, vector<8x128xf32>, vector<16x128xf32> -> vector<16x128xf32>
    %76 = arith.addf %67, %75 : vector<16x128xf32>
    %cst_48 = arith.constant 2.000000e-01 : f32
    %77 = vector.broadcast %cst_48 : f32 to vector<16x128xf32>
    %78 = arith.mulf %77, %76 : vector<16x128xf32>
    %79 = arith.maximumf %76, %78 : vector<16x128xf32>
    %c124_i32_49 = arith.constant 124 : i32
    %80 = tpu.dynamic_rotate %79 by %c124_i32_49 dim 1 : vector<16x128xf32>, i32 -> vector<16x128xf32>
    %81 = arith.addf %79, %80 : vector<16x128xf32>
    %c1_50 = arith.constant 1 : index
    %c0_51 = arith.constant 0 : index
    %c0_52 = arith.constant 0 : index
    %82 = vector.load %arg5[%c1_50, %c0_51, %c0_52] : memref<3x16x16xf32, #tpu.memory_space<vmem>>, vector<1x16x16xf32>
    %83 = vector.shape_cast %82 : vector<1x16x16xf32> to vector<16x16xf32>
    %cst_53 = arith.constant dense<0.000000e+00> : vector<16x128xf32>
    %84 = tpu.matmul %83, %81, %cst_53 {dimension_numbers = #tpu.dot_dimension_numbers<[1], [0], [0], [1], [0, 0, 1, 1], [], []>} : vector<16x16xf32>, vector<16x128xf32>, vector<16x128xf32> -> vector<16x128xf32>
    %c0_54 = arith.constant 0 : index
    %c0_55 = arith.constant 0 : index
    %c0_56 = arith.constant 0 : index
    %85 = vector.load %arg5[%c0_54, %c0_55, %c0_56] : memref<3x16x16xf32, #tpu.memory_space<vmem>>, vector<1x16x16xf32>
    %86 = vector.shape_cast %85 : vector<1x16x16xf32> to vector<16x16xf32>
    %87 = tpu.iota {dimensions = array<i32: 1>} : vector<16x128xi32>
    %c8_i32 = arith.constant 8 : i32
    %88 = vector.broadcast %c8_i32 : i32 to vector<16x128xi32>
    %89 = arith.cmpi sge, %87, %88 : vector<16x128xi32>
    %c8_i32_57 = arith.constant 8 : i32
    %90 = tpu.dynamic_rotate %81 by %c8_i32_57 dim 1 : vector<16x128xf32>, i32 -> vector<16x128xf32>
    %cst_58 = arith.constant 0.000000e+00 : f32
    %91 = vector.broadcast %cst_58 : f32 to vector<16x128xf32>
    %92 = arith.select %89, %90, %91 : vector<16x128xi1>, vector<16x128xf32>
    %cst_59 = arith.constant dense<0.000000e+00> : vector<16x128xf32>
    %93 = tpu.matmul %86, %92, %cst_59 {dimension_numbers = #tpu.dot_dimension_numbers<[1], [0], [0], [1], [0, 0, 1, 1], [], []>} : vector<16x16xf32>, vector<16x128xf32>, vector<16x128xf32> -> vector<16x128xf32>
    %94 = arith.addf %84, %93 : vector<16x128xf32>
    %c2_60 = arith.constant 2 : index
    %c0_61 = arith.constant 0 : index
    %c0_62 = arith.constant 0 : index
    %95 = vector.load %arg5[%c2_60, %c0_61, %c0_62] : memref<3x16x16xf32, #tpu.memory_space<vmem>>, vector<1x16x16xf32>
    %96 = vector.shape_cast %95 : vector<1x16x16xf32> to vector<16x16xf32>
    %c24_i32 = arith.constant 24 : i32
    %97 = vector.broadcast %c24_i32 : i32 to vector<16x128xi32>
    %98 = arith.cmpi slt, %87, %97 : vector<16x128xi32>
    %c120_i32 = arith.constant 120 : i32
    %99 = tpu.dynamic_rotate %81 by %c120_i32 dim 1 : vector<16x128xf32>, i32 -> vector<16x128xf32>
    %cst_63 = arith.constant 0.000000e+00 : f32
    %100 = vector.broadcast %cst_63 : f32 to vector<16x128xf32>
    %101 = arith.select %98, %99, %100 : vector<16x128xi1>, vector<16x128xf32>
    %cst_64 = arith.constant dense<0.000000e+00> : vector<16x128xf32>
    %102 = tpu.matmul %96, %101, %cst_64 {dimension_numbers = #tpu.dot_dimension_numbers<[1], [0], [0], [1], [0, 0, 1, 1], [], []>} : vector<16x16xf32>, vector<16x128xf32>, vector<16x128xf32> -> vector<16x128xf32>
    %103 = arith.addf %94, %102 : vector<16x128xf32>
    %cst_65 = arith.constant 2.000000e-01 : f32
    %104 = vector.broadcast %cst_65 : f32 to vector<16x128xf32>
    %105 = arith.mulf %104, %103 : vector<16x128xf32>
    %106 = arith.maximumf %103, %105 : vector<16x128xf32>
    %c120_i32_66 = arith.constant 120 : i32
    %107 = tpu.dynamic_rotate %106 by %c120_i32_66 dim 1 : vector<16x128xf32>, i32 -> vector<16x128xf32>
    %108 = arith.addf %106, %107 : vector<16x128xf32>
    %c0_67 = arith.constant 0 : index
    %c0_68 = arith.constant 0 : index
    %c0_69 = arith.constant 0 : index
    %109 = vector.load %arg6[%c0_67, %c0_68, %c0_69] : memref<2x32x16xf32, #tpu.memory_space<vmem>>, vector<1x32x16xf32>
    %110 = vector.shape_cast %109 : vector<1x32x16xf32> to vector<32x16xf32>
    %cst_70 = arith.constant dense<0.000000e+00> : vector<32x128xf32>
    %111 = tpu.matmul %110, %108, %cst_70 {dimension_numbers = #tpu.dot_dimension_numbers<[1], [0], [0], [1], [0, 0, 1, 1], [], []>} : vector<32x16xf32>, vector<16x128xf32>, vector<32x128xf32> -> vector<32x128xf32>
    %c1_71 = arith.constant 1 : index
    %c0_72 = arith.constant 0 : index
    %c0_73 = arith.constant 0 : index
    %112 = vector.load %arg6[%c1_71, %c0_72, %c0_73] : memref<2x32x16xf32, #tpu.memory_space<vmem>>, vector<1x32x16xf32>
    %113 = vector.shape_cast %112 : vector<1x32x16xf32> to vector<32x16xf32>
    %c16_i32 = arith.constant 16 : i32
    %114 = vector.broadcast %c16_i32 : i32 to vector<16x128xi32>
    %115 = arith.cmpi slt, %87, %114 : vector<16x128xi32>
    %c112_i32 = arith.constant 112 : i32
    %116 = tpu.dynamic_rotate %108 by %c112_i32 dim 1 : vector<16x128xf32>, i32 -> vector<16x128xf32>
    %cst_74 = arith.constant 0.000000e+00 : f32
    %117 = vector.broadcast %cst_74 : f32 to vector<16x128xf32>
    %118 = arith.select %115, %116, %117 : vector<16x128xi1>, vector<16x128xf32>
    %cst_75 = arith.constant dense<0.000000e+00> : vector<32x128xf32>
    %119 = tpu.matmul %113, %118, %cst_75 {dimension_numbers = #tpu.dot_dimension_numbers<[1], [0], [0], [1], [0, 0, 1, 1], [], []>} : vector<32x16xf32>, vector<16x128xf32>, vector<32x128xf32> -> vector<32x128xf32>
    %120 = arith.addf %111, %119 : vector<32x128xf32>
    %121 = tpu.iota {dimensions = array<i32: 1>} : vector<32x128xi32>
    %c16_i32_76 = arith.constant 16 : i32
    %122 = vector.broadcast %c16_i32_76 : i32 to vector<32x128xi32>
    %123 = arith.cmpi slt, %121, %122 : vector<32x128xi32>
    %cst_77 = arith.constant 0.000000e+00 : f32
    %124 = vector.broadcast %cst_77 : f32 to vector<32x128xf32>
    %125 = arith.select %123, %120, %124 : vector<32x128xi1>, vector<32x128xf32>
    %c0_78 = arith.constant 0 : index
    %c0_79 = arith.constant 0 : index
    %c0_80 = arith.constant 0 : index
    %126 = vector.load %arg7[%c0_78, %c0_79, %c0_80] : memref<2x16x32xf32, #tpu.memory_space<vmem>>, vector<1x16x32xf32>
    %127 = vector.shape_cast %126 : vector<1x16x32xf32> to vector<16x32xf32>
    %cst_81 = arith.constant dense<0.000000e+00> : vector<16x128xf32>
    %128 = tpu.matmul %127, %125, %cst_81 {dimension_numbers = #tpu.dot_dimension_numbers<[1], [0], [0], [1], [0, 0, 1, 1], [], []>} : vector<16x32xf32>, vector<32x128xf32>, vector<16x128xf32> -> vector<16x128xf32>
    %c1_82 = arith.constant 1 : index
    %c0_83 = arith.constant 0 : index
    %c0_84 = arith.constant 0 : index
    %129 = vector.load %arg7[%c1_82, %c0_83, %c0_84] : memref<2x16x32xf32, #tpu.memory_space<vmem>>, vector<1x16x32xf32>
    %130 = vector.shape_cast %129 : vector<1x16x32xf32> to vector<16x32xf32>
    %c16_i32_85 = arith.constant 16 : i32
    %131 = vector.broadcast %c16_i32_85 : i32 to vector<32x128xi32>
    %132 = arith.cmpi sge, %121, %131 : vector<32x128xi32>
    %c16_i32_86 = arith.constant 16 : i32
    %133 = tpu.dynamic_rotate %125 by %c16_i32_86 dim 1 : vector<32x128xf32>, i32 -> vector<32x128xf32>
    %cst_87 = arith.constant 0.000000e+00 : f32
    %134 = vector.broadcast %cst_87 : f32 to vector<32x128xf32>
    %135 = arith.select %132, %133, %134 : vector<32x128xi1>, vector<32x128xf32>
    %cst_88 = arith.constant dense<0.000000e+00> : vector<16x128xf32>
    %136 = tpu.matmul %130, %135, %cst_88 {dimension_numbers = #tpu.dot_dimension_numbers<[1], [0], [0], [1], [0, 0, 1, 1], [], []>} : vector<16x32xf32>, vector<32x128xf32>, vector<16x128xf32> -> vector<16x128xf32>
    %137 = arith.addf %128, %136 : vector<16x128xf32>
    %cst_89 = arith.constant 2.000000e-01 : f32
    %138 = vector.broadcast %cst_89 : f32 to vector<16x128xf32>
    %139 = arith.mulf %138, %137 : vector<16x128xf32>
    %140 = arith.maximumf %137, %139 : vector<16x128xf32>
    %c8_i32_90 = arith.constant 8 : i32
    %141 = vector.broadcast %c8_i32_90 : i32 to vector<16x128xi32>
    %142 = arith.andi %87, %141 : vector<16x128xi32>
    %c0_i32 = arith.constant 0 : i32
    %143 = vector.broadcast %c0_i32 : i32 to vector<16x128xi32>
    %144 = arith.cmpi ne, %142, %143 : vector<16x128xi32>
    %c8_i32_91 = arith.constant 8 : i32
    %145 = tpu.dynamic_rotate %140 by %c8_i32_91 dim 1 : vector<16x128xf32>, i32 -> vector<16x128xf32>
    %146 = arith.select %144, %145, %140 : vector<16x128xi1>, vector<16x128xf32>
    %c1_92 = arith.constant 1 : index
    %c0_93 = arith.constant 0 : index
    %c0_94 = arith.constant 0 : index
    %147 = vector.load %arg8[%c1_92, %c0_93, %c0_94] : memref<3x16x16xf32, #tpu.memory_space<vmem>>, vector<1x16x16xf32>
    %148 = vector.shape_cast %147 : vector<1x16x16xf32> to vector<16x16xf32>
    %cst_95 = arith.constant dense<0.000000e+00> : vector<16x128xf32>
    %149 = tpu.matmul %148, %146, %cst_95 {dimension_numbers = #tpu.dot_dimension_numbers<[1], [0], [0], [1], [0, 0, 1, 1], [], []>} : vector<16x16xf32>, vector<16x128xf32>, vector<16x128xf32> -> vector<16x128xf32>
    %c0_96 = arith.constant 0 : index
    %c0_97 = arith.constant 0 : index
    %c0_98 = arith.constant 0 : index
    %150 = vector.load %arg8[%c0_96, %c0_97, %c0_98] : memref<3x16x16xf32, #tpu.memory_space<vmem>>, vector<1x16x16xf32>
    %151 = vector.shape_cast %150 : vector<1x16x16xf32> to vector<16x16xf32>
    %c8_i32_99 = arith.constant 8 : i32
    %152 = tpu.dynamic_rotate %146 by %c8_i32_99 dim 1 : vector<16x128xf32>, i32 -> vector<16x128xf32>
    %cst_100 = arith.constant 0.000000e+00 : f32
    %153 = vector.broadcast %cst_100 : f32 to vector<16x128xf32>
    %154 = arith.select %89, %152, %153 : vector<16x128xi1>, vector<16x128xf32>
    %cst_101 = arith.constant dense<0.000000e+00> : vector<16x128xf32>
    %155 = tpu.matmul %151, %154, %cst_101 {dimension_numbers = #tpu.dot_dimension_numbers<[1], [0], [0], [1], [0, 0, 1, 1], [], []>} : vector<16x16xf32>, vector<16x128xf32>, vector<16x128xf32> -> vector<16x128xf32>
    %156 = arith.addf %149, %155 : vector<16x128xf32>
    %c2_102 = arith.constant 2 : index
    %c0_103 = arith.constant 0 : index
    %c0_104 = arith.constant 0 : index
    %157 = vector.load %arg8[%c2_102, %c0_103, %c0_104] : memref<3x16x16xf32, #tpu.memory_space<vmem>>, vector<1x16x16xf32>
    %158 = vector.shape_cast %157 : vector<1x16x16xf32> to vector<16x16xf32>
    %c120_i32_105 = arith.constant 120 : i32
    %159 = tpu.dynamic_rotate %146 by %c120_i32_105 dim 1 : vector<16x128xf32>, i32 -> vector<16x128xf32>
    %cst_106 = arith.constant 0.000000e+00 : f32
    %160 = vector.broadcast %cst_106 : f32 to vector<16x128xf32>
    %161 = arith.select %98, %159, %160 : vector<16x128xi1>, vector<16x128xf32>
    %cst_107 = arith.constant dense<0.000000e+00> : vector<16x128xf32>
    %162 = tpu.matmul %158, %161, %cst_107 {dimension_numbers = #tpu.dot_dimension_numbers<[1], [0], [0], [1], [0, 0, 1, 1], [], []>} : vector<16x16xf32>, vector<16x128xf32>, vector<16x128xf32> -> vector<16x128xf32>
    %163 = arith.addf %156, %162 : vector<16x128xf32>
    %cst_108 = arith.constant 2.000000e-01 : f32
    %164 = vector.broadcast %cst_108 : f32 to vector<16x128xf32>
    %165 = arith.mulf %164, %163 : vector<16x128xf32>
    %166 = arith.maximumf %163, %165 : vector<16x128xf32>
    %c4_i32_109 = arith.constant 4 : i32
    %167 = vector.broadcast %c4_i32_109 : i32 to vector<16x128xi32>
    %168 = arith.andi %87, %167 : vector<16x128xi32>
    %c0_i32_110 = arith.constant 0 : i32
    %169 = vector.broadcast %c0_i32_110 : i32 to vector<16x128xi32>
    %170 = arith.cmpi ne, %168, %169 : vector<16x128xi32>
    %c4_i32_111 = arith.constant 4 : i32
    %171 = tpu.dynamic_rotate %166 by %c4_i32_111 dim 1 : vector<16x128xf32>, i32 -> vector<16x128xf32>
    %172 = arith.select %170, %171, %166 : vector<16x128xi1>, vector<16x128xf32>
    %c1_112 = arith.constant 1 : index
    %c0_113 = arith.constant 0 : index
    %c0_114 = arith.constant 0 : index
    %173 = vector.load %arg9[%c1_112, %c0_113, %c0_114] : memref<3x8x16xf32, #tpu.memory_space<vmem>>, vector<1x8x16xf32>
    %174 = vector.shape_cast %173 : vector<1x8x16xf32> to vector<8x16xf32>
    %cst_115 = arith.constant dense<0.000000e+00> : vector<8x128xf32>
    %175 = tpu.matmul %174, %172, %cst_115 {dimension_numbers = #tpu.dot_dimension_numbers<[1], [0], [0], [1], [0, 0, 1, 1], [], []>} : vector<8x16xf32>, vector<16x128xf32>, vector<8x128xf32> -> vector<8x128xf32>
    %c0_116 = arith.constant 0 : index
    %c0_117 = arith.constant 0 : index
    %c0_118 = arith.constant 0 : index
    %176 = vector.load %arg9[%c0_116, %c0_117, %c0_118] : memref<3x8x16xf32, #tpu.memory_space<vmem>>, vector<1x8x16xf32>
    %177 = vector.shape_cast %176 : vector<1x8x16xf32> to vector<8x16xf32>
    %c4_i32_119 = arith.constant 4 : i32
    %178 = vector.broadcast %c4_i32_119 : i32 to vector<16x128xi32>
    %179 = arith.cmpi sge, %87, %178 : vector<16x128xi32>
    %c4_i32_120 = arith.constant 4 : i32
    %180 = tpu.dynamic_rotate %172 by %c4_i32_120 dim 1 : vector<16x128xf32>, i32 -> vector<16x128xf32>
    %cst_121 = arith.constant 0.000000e+00 : f32
    %181 = vector.broadcast %cst_121 : f32 to vector<16x128xf32>
    %182 = arith.select %179, %180, %181 : vector<16x128xi1>, vector<16x128xf32>
    %cst_122 = arith.constant dense<0.000000e+00> : vector<8x128xf32>
    %183 = tpu.matmul %177, %182, %cst_122 {dimension_numbers = #tpu.dot_dimension_numbers<[1], [0], [0], [1], [0, 0, 1, 1], [], []>} : vector<8x16xf32>, vector<16x128xf32>, vector<8x128xf32> -> vector<8x128xf32>
    %184 = arith.addf %175, %183 : vector<8x128xf32>
    %c2_123 = arith.constant 2 : index
    %c0_124 = arith.constant 0 : index
    %c0_125 = arith.constant 0 : index
    %185 = vector.load %arg9[%c2_123, %c0_124, %c0_125] : memref<3x8x16xf32, #tpu.memory_space<vmem>>, vector<1x8x16xf32>
    %186 = vector.shape_cast %185 : vector<1x8x16xf32> to vector<8x16xf32>
    %c28_i32_126 = arith.constant 28 : i32
    %187 = vector.broadcast %c28_i32_126 : i32 to vector<16x128xi32>
    %188 = arith.cmpi slt, %87, %187 : vector<16x128xi32>
    %c124_i32_127 = arith.constant 124 : i32
    %189 = tpu.dynamic_rotate %172 by %c124_i32_127 dim 1 : vector<16x128xf32>, i32 -> vector<16x128xf32>
    %cst_128 = arith.constant 0.000000e+00 : f32
    %190 = vector.broadcast %cst_128 : f32 to vector<16x128xf32>
    %191 = arith.select %188, %189, %190 : vector<16x128xi1>, vector<16x128xf32>
    %cst_129 = arith.constant dense<0.000000e+00> : vector<8x128xf32>
    %192 = tpu.matmul %186, %191, %cst_129 {dimension_numbers = #tpu.dot_dimension_numbers<[1], [0], [0], [1], [0, 0, 1, 1], [], []>} : vector<8x16xf32>, vector<16x128xf32>, vector<8x128xf32> -> vector<8x128xf32>
    %193 = arith.addf %184, %192 : vector<8x128xf32>
    %cst_130 = arith.constant 2.000000e-01 : f32
    %194 = vector.broadcast %cst_130 : f32 to vector<8x128xf32>
    %195 = arith.mulf %194, %193 : vector<8x128xf32>
    %196 = arith.maximumf %193, %195 : vector<8x128xf32>
    %c2_i32_131 = arith.constant 2 : i32
    %197 = vector.broadcast %c2_i32_131 : i32 to vector<8x128xi32>
    %198 = arith.andi %34, %197 : vector<8x128xi32>
    %c0_i32_132 = arith.constant 0 : i32
    %199 = vector.broadcast %c0_i32_132 : i32 to vector<8x128xi32>
    %200 = arith.cmpi ne, %198, %199 : vector<8x128xi32>
    %c2_i32_133 = arith.constant 2 : i32
    %201 = tpu.dynamic_rotate %196 by %c2_i32_133 dim 1 : vector<8x128xf32>, i32 -> vector<8x128xf32>
    %202 = arith.select %200, %201, %196 : vector<8x128xi1>, vector<8x128xf32>
    %c1_134 = arith.constant 1 : index
    %c0_135 = arith.constant 0 : index
    %c0_136 = arith.constant 0 : index
    %203 = vector.load %arg10[%c1_134, %c0_135, %c0_136] : memref<3x8x8xf32, #tpu.memory_space<vmem>>, vector<1x8x8xf32>
    %204 = vector.shape_cast %203 : vector<1x8x8xf32> to vector<8x8xf32>
    %cst_137 = arith.constant dense<0.000000e+00> : vector<8x128xf32>
    %205 = tpu.matmul %204, %202, %cst_137 {dimension_numbers = #tpu.dot_dimension_numbers<[1], [0], [0], [1], [0, 0, 1, 1], [], []>} : vector<8x8xf32>, vector<8x128xf32>, vector<8x128xf32> -> vector<8x128xf32>
    %c0_138 = arith.constant 0 : index
    %c0_139 = arith.constant 0 : index
    %c0_140 = arith.constant 0 : index
    %206 = vector.load %arg10[%c0_138, %c0_139, %c0_140] : memref<3x8x8xf32, #tpu.memory_space<vmem>>, vector<1x8x8xf32>
    %207 = vector.shape_cast %206 : vector<1x8x8xf32> to vector<8x8xf32>
    %c2_i32_141 = arith.constant 2 : i32
    %208 = tpu.dynamic_rotate %202 by %c2_i32_141 dim 1 : vector<8x128xf32>, i32 -> vector<8x128xf32>
    %cst_142 = arith.constant 0.000000e+00 : f32
    %209 = vector.broadcast %cst_142 : f32 to vector<8x128xf32>
    %210 = arith.select %36, %208, %209 : vector<8x128xi1>, vector<8x128xf32>
    %cst_143 = arith.constant dense<0.000000e+00> : vector<8x128xf32>
    %211 = tpu.matmul %207, %210, %cst_143 {dimension_numbers = #tpu.dot_dimension_numbers<[1], [0], [0], [1], [0, 0, 1, 1], [], []>} : vector<8x8xf32>, vector<8x128xf32>, vector<8x128xf32> -> vector<8x128xf32>
    %212 = arith.addf %205, %211 : vector<8x128xf32>
    %c2_144 = arith.constant 2 : index
    %c0_145 = arith.constant 0 : index
    %c0_146 = arith.constant 0 : index
    %213 = vector.load %arg10[%c2_144, %c0_145, %c0_146] : memref<3x8x8xf32, #tpu.memory_space<vmem>>, vector<1x8x8xf32>
    %214 = vector.shape_cast %213 : vector<1x8x8xf32> to vector<8x8xf32>
    %c126_i32_147 = arith.constant 126 : i32
    %215 = tpu.dynamic_rotate %202 by %c126_i32_147 dim 1 : vector<8x128xf32>, i32 -> vector<8x128xf32>
    %cst_148 = arith.constant 0.000000e+00 : f32
    %216 = vector.broadcast %cst_148 : f32 to vector<8x128xf32>
    %217 = arith.select %45, %215, %216 : vector<8x128xi1>, vector<8x128xf32>
    %cst_149 = arith.constant dense<0.000000e+00> : vector<8x128xf32>
    %218 = tpu.matmul %214, %217, %cst_149 {dimension_numbers = #tpu.dot_dimension_numbers<[1], [0], [0], [1], [0, 0, 1, 1], [], []>} : vector<8x8xf32>, vector<8x128xf32>, vector<8x128xf32> -> vector<8x128xf32>
    %219 = arith.addf %212, %218 : vector<8x128xf32>
    %cst_150 = arith.constant 2.000000e-01 : f32
    %220 = vector.broadcast %cst_150 : f32 to vector<8x128xf32>
    %221 = arith.mulf %220, %219 : vector<8x128xf32>
    %222 = arith.maximumf %219, %221 : vector<8x128xf32>
    %c1_i32_151 = arith.constant 1 : i32
    %223 = vector.broadcast %c1_i32_151 : i32 to vector<8x128xi32>
    %224 = arith.andi %34, %223 : vector<8x128xi32>
    %c0_i32_152 = arith.constant 0 : i32
    %225 = vector.broadcast %c0_i32_152 : i32 to vector<8x128xi32>
    %226 = arith.cmpi ne, %224, %225 : vector<8x128xi32>
    %c1_i32_153 = arith.constant 1 : i32
    %227 = tpu.dynamic_rotate %222 by %c1_i32_153 dim 1 : vector<8x128xf32>, i32 -> vector<8x128xf32>
    %228 = arith.select %226, %227, %222 : vector<8x128xi1>, vector<8x128xf32>
    %c1_154 = arith.constant 1 : index
    %c0_155 = arith.constant 0 : index
    %c0_156 = arith.constant 0 : index
    %229 = vector.load %arg11[%c1_154, %c0_155, %c0_156] : memref<3x2x8xf32, #tpu.memory_space<vmem>>, vector<1x2x8xf32>
    %230 = vector.shape_cast %229 : vector<1x2x8xf32> to vector<2x8xf32>
    %cst_157 = arith.constant dense<0.000000e+00> : vector<2x128xf32>
    %231 = tpu.matmul %230, %228, %cst_157 {dimension_numbers = #tpu.dot_dimension_numbers<[1], [0], [0], [1], [0, 0, 1, 1], [], []>} : vector<2x8xf32>, vector<8x128xf32>, vector<2x128xf32> -> vector<2x128xf32>
    %c0_158 = arith.constant 0 : index
    %c0_159 = arith.constant 0 : index
    %c0_160 = arith.constant 0 : index
    %232 = vector.load %arg11[%c0_158, %c0_159, %c0_160] : memref<3x2x8xf32, #tpu.memory_space<vmem>>, vector<1x2x8xf32>
    %233 = vector.shape_cast %232 : vector<1x2x8xf32> to vector<2x8xf32>
    %c1_i32_161 = arith.constant 1 : i32
    %234 = vector.broadcast %c1_i32_161 : i32 to vector<8x128xi32>
    %235 = arith.cmpi sge, %34, %234 : vector<8x128xi32>
    %c1_i32_162 = arith.constant 1 : i32
    %236 = tpu.dynamic_rotate %228 by %c1_i32_162 dim 1 : vector<8x128xf32>, i32 -> vector<8x128xf32>
    %cst_163 = arith.constant 0.000000e+00 : f32
    %237 = vector.broadcast %cst_163 : f32 to vector<8x128xf32>
    %238 = arith.select %235, %236, %237 : vector<8x128xi1>, vector<8x128xf32>
    %cst_164 = arith.constant dense<0.000000e+00> : vector<2x128xf32>
    %239 = tpu.matmul %233, %238, %cst_164 {dimension_numbers = #tpu.dot_dimension_numbers<[1], [0], [0], [1], [0, 0, 1, 1], [], []>} : vector<2x8xf32>, vector<8x128xf32>, vector<2x128xf32> -> vector<2x128xf32>
    %240 = arith.addf %231, %239 : vector<2x128xf32>
    %c2_165 = arith.constant 2 : index
    %c0_166 = arith.constant 0 : index
    %c0_167 = arith.constant 0 : index
    %241 = vector.load %arg11[%c2_165, %c0_166, %c0_167] : memref<3x2x8xf32, #tpu.memory_space<vmem>>, vector<1x2x8xf32>
    %242 = vector.shape_cast %241 : vector<1x2x8xf32> to vector<2x8xf32>
    %c31_i32_168 = arith.constant 31 : i32
    %243 = vector.broadcast %c31_i32_168 : i32 to vector<8x128xi32>
    %244 = arith.cmpi slt, %34, %243 : vector<8x128xi32>
    %c127_i32_169 = arith.constant 127 : i32
    %245 = tpu.dynamic_rotate %228 by %c127_i32_169 dim 1 : vector<8x128xf32>, i32 -> vector<8x128xf32>
    %cst_170 = arith.constant 0.000000e+00 : f32
    %246 = vector.broadcast %cst_170 : f32 to vector<8x128xf32>
    %247 = arith.select %244, %245, %246 : vector<8x128xi1>, vector<8x128xf32>
    %cst_171 = arith.constant dense<0.000000e+00> : vector<2x128xf32>
    %248 = tpu.matmul %242, %247, %cst_171 {dimension_numbers = #tpu.dot_dimension_numbers<[1], [0], [0], [1], [0, 0, 1, 1], [], []>} : vector<2x8xf32>, vector<8x128xf32>, vector<2x128xf32> -> vector<2x128xf32>
    %249 = arith.addf %240, %248 : vector<2x128xf32>
    %250 = math.tanh %249 : vector<2x128xf32>
    %c0_172 = arith.constant 0 : index
    %c0_173 = arith.constant 0 : index
    %c0_174 = arith.constant 0 : index
    %251 = vector.load %arg12[%c0_172, %c0_173, %c0_174] : memref<1x2x128xf32, #tpu.memory_space<vmem>>, vector<1x2x128xf32>
    %252 = vector.shape_cast %251 : vector<1x2x128xf32> to vector<2x128xf32>
    %253 = vector.shape_cast %250 : vector<2x128xf32> to vector<1x2x128xf32>
    tpu.vector_store %arg12[%c0_172, %c0_173, %c0_174], %253 {strides = array<i32>} : memref<1x2x128xf32, #tpu.memory_space<vmem>>, vector<1x2x128xf32>,
    return
  }
  func.func @transform_0(%arg0: i32) -> (i32, i32, i32) {
    %c0_i32 = arith.constant 0 : i32
    %c0_i32_0 = arith.constant 0 : i32
    %c0_i32_1 = arith.constant 0 : i32
    return %arg0, %c0_i32, %c0_i32_0 : i32, i32, i32
  }
  func.func @transform_1(%arg0: i32) -> (i32, i32, i32) {
    %c0_i32 = arith.constant 0 : i32
    %c0_i32_0 = arith.constant 0 : i32
    %c0_i32_1 = arith.constant 0 : i32
    %c0_i32_2 = arith.constant 0 : i32
    return %c0_i32, %c0_i32_0, %c0_i32_1 : i32, i32, i32
  }
  func.func @transform_2(%arg0: i32) -> (i32, i32, i32) {
    %c0_i32 = arith.constant 0 : i32
    %c0_i32_0 = arith.constant 0 : i32
    %c0_i32_1 = arith.constant 0 : i32
    %c0_i32_2 = arith.constant 0 : i32
    return %c0_i32, %c0_i32_0, %c0_i32_1 : i32, i32, i32
  }
  func.func @transform_3(%arg0: i32) -> (i32, i32, i32) {
    %c0_i32 = arith.constant 0 : i32
    %c0_i32_0 = arith.constant 0 : i32
    %c0_i32_1 = arith.constant 0 : i32
    %c0_i32_2 = arith.constant 0 : i32
    return %c0_i32, %c0_i32_0, %c0_i32_1 : i32, i32, i32
  }
  func.func @transform_4(%arg0: i32) -> (i32, i32, i32) {
    %c0_i32 = arith.constant 0 : i32
    %c0_i32_0 = arith.constant 0 : i32
    %c0_i32_1 = arith.constant 0 : i32
    %c0_i32_2 = arith.constant 0 : i32
    return %c0_i32, %c0_i32_0, %c0_i32_1 : i32, i32, i32
  }
  func.func @transform_5(%arg0: i32) -> (i32, i32, i32) {
    %c0_i32 = arith.constant 0 : i32
    %c0_i32_0 = arith.constant 0 : i32
    %c0_i32_1 = arith.constant 0 : i32
    %c0_i32_2 = arith.constant 0 : i32
    return %c0_i32, %c0_i32_0, %c0_i32_1 : i32, i32, i32
  }
  func.func @transform_6(%arg0: i32) -> (i32, i32, i32) {
    %c0_i32 = arith.constant 0 : i32
    %c0_i32_0 = arith.constant 0 : i32
    %c0_i32_1 = arith.constant 0 : i32
    %c0_i32_2 = arith.constant 0 : i32
    return %c0_i32, %c0_i32_0, %c0_i32_1 : i32, i32, i32
  }
  func.func @transform_7(%arg0: i32) -> (i32, i32, i32) {
    %c0_i32 = arith.constant 0 : i32
    %c0_i32_0 = arith.constant 0 : i32
    %c0_i32_1 = arith.constant 0 : i32
    %c0_i32_2 = arith.constant 0 : i32
    return %c0_i32, %c0_i32_0, %c0_i32_1 : i32, i32, i32
  }
  func.func @transform_8(%arg0: i32) -> (i32, i32, i32) {
    %c0_i32 = arith.constant 0 : i32
    %c0_i32_0 = arith.constant 0 : i32
    %c0_i32_1 = arith.constant 0 : i32
    %c0_i32_2 = arith.constant 0 : i32
    return %c0_i32, %c0_i32_0, %c0_i32_1 : i32, i32, i32
  }
  func.func @transform_9(%arg0: i32) -> (i32, i32, i32) {
    %c0_i32 = arith.constant 0 : i32
    %c0_i32_0 = arith.constant 0 : i32
    %c0_i32_1 = arith.constant 0 : i32
    %c0_i32_2 = arith.constant 0 : i32
    return %c0_i32, %c0_i32_0, %c0_i32_1 : i32, i32, i32
  }
  func.func @transform_10(%arg0: i32) -> (i32, i32, i32) {
    %c0_i32 = arith.constant 0 : i32
    %c0_i32_0 = arith.constant 0 : i32
    %c0_i32_1 = arith.constant 0 : i32
    %c0_i32_2 = arith.constant 0 : i32
    return %c0_i32, %c0_i32_0, %c0_i32_1 : i32, i32, i32
  }
  func.func @transform_11(%arg0: i32) -> (i32, i32, i32) {
    %c0_i32 = arith.constant 0 : i32
    %c0_i32_0 = arith.constant 0 : i32
    %c0_i32_1 = arith.constant 0 : i32
    return %arg0, %c0_i32, %c0_i32_0 : i32, i32, i32
  }
}

</mosaic_0001>

<bundles_post_ra>
// kernel: aecoder_forward.1
= control target key start
LH: loop header
LB: loop body
LE: loop exit
PB: predicated region body
PF: predicated region fallthrough
CT: control target
= control target key end

     0   :  { %s4090_s0 = inlined_call_operand.vmem [shape: f32[2,2,128], index: 0, kind: input, shape index: {}]   ;;  %s4091_s1 = inlined_call_operand.vmem [shape: f32[3,8,2], index: 1, kind: input, shape index: {}]   ;;  %s4092_s2 = inlined_call_operand.vmem [shape: f32[3,8,8], index: 2, kind: input, shape index: {}]   ;;  %s4093_s3 = inlined_call_operand.vmem [shape: f32[3,16,8], index: 3, kind: input, shape index: {}]   ;;  %s4094_s4 = inlined_call_operand.vmem [shape: f32[3,16,16], index: 4, kind: input, shape index: {}]   ;;  %s4095_s5 = inlined_call_operand.vmem [shape: f32[2,32,16], index: 5, kind: input, shape index: {}]   ;;  %s4096_s6 = inlined_call_operand.vmem [shape: f32[2,16,32], index: 6, kind: input, shape index: {}]   ;;  %s4097_s7 = inlined_call_operand.vmem [shape: f32[3,16,16], index: 7, kind: input, shape index: {}]   ;;  %s4098_s8 = inlined_call_operand.vmem [shape: f32[3,8,16], index: 8, kind: input, shape index: {}]   ;;  %s4099_s9 = inlined_call_operand.vmem [shape: f32[3,8,8], index: 9, kind: input, shape index: {}]   ;;  %s4100_s10 = inlined_call_operand.vmem [shape: f32[3,2,8], index: 10, kind: input, shape index: {}]   ;;  %s4101_s11 = inlined_call_operand.hbm [shape: f32[2,2,128], index: 11, kind: output, shape index: {}]  }
   0x1   :  { %4111 = sst [smem:[#allocation5_spill]] %s4090_s0 }
   0x2   :  { %16 = vsyncpa [#allocation3], 0 }
   0x3   :  { %18 = vsyncpa [#allocation3 + $0x1], 0  ;;  %s3642_s17 = smov 0   ;;  %s3644_s18 = smov 0  }
   0x4   :  { %s3646_s19 = smov 0   ;;  %s3648_s20 = smov 0  }
   0x5 LB: > { %s3663_s21 = sadd.s32 4294967295, %s3566_s20   ;;  %s2894_s22 = sadd.s32 4294967294, %s3566_s20   ;;  %s3566_s20 = sphi %s3648_s20, %s4130_s20   ;;  %s3562_s19 = sphi %s3646_s19, %s4129_s19   ;;  %s3558_s18 = sphi %s3644_s18, %s4128_s18   ;;  %s3554_s17 = sphi %s3642_s17, %s4127_s17  }
   0x6   : > { %s3667_s23 = sadd.s32 1, %s3566_s20   ;;  %s267_s24 = sadd.s32 1, %s3562_s19 }
   0x7   : > { %s264_s25 = ssub.s32 %s3566_s20, %s3667_s23  ;;  %p277_p0 = scmp.ne.s32.totalorder %s3562_s19, %s3558_s18 }
   0x8   : > { %p265_p1 = scmp.eq.s32.totalorder %s264_s25, 0  ;;  %p278_p2 = scmp.eq.s32.totalorder %s3663_s21, 1 }
   0x9   : > { %p283_p3 = scmp.ne.s32.totalorder %s3558_s18, %s3554_s17  ;;  %p284_p4 = scmp.eq.s32.totalorder %s2894_s22, 1 }
   0xa   : > { %s3678_s26 = scalar_select %p265_p1, %s3562_s19, %s267_s24  }
   0xb   : > { %p3680_p5 = por %p278_p2, %p277_p0  ;;  %p3684_p6 = por %p284_p4, %p283_p3 }
   0xc   : > { %p2897_p7 = scmp.ge.s32.totalorder %s3566_s20, 1  ;;  %p339_p8 = scmp.lt.s32.totalorder %s3566_s20, 3 }
   0xe   : > { %p340_p9 = pnand %p2897_p7, %p339_p8 }
   0xf   : > { %p378_p10 = scmp.lt.s32.totalorder (!%p340_p9), %s3663_s21, 1  ;;  %v3568_v0 = vmov (!%p340_p9), 0.0   ;;  %vm3569_vm0 = vmmov (!%p340_p9), 0   ;;  %s4114_s0 = sld [smem:[#allocation5_spill]] (!%p340_p9)  ;;  %v386_v2 = vlaneseq (!%p340_p9)  ;;  %vm396_vm2 = vcmask (!%p340_p9), 1041408   ;;  %v385_v5 = vld [vmem:[%s4091_s1] sm:$0xff] (!%p340_p9) }
  0x10   : > { %343 = sbr.rel (%p340_p9) target bundleno = 4505 (0x1199), region = 64  ;;  %3100 = vmatprep.subr.mxu0 (!%p340_p9), %v3568_v0  ;;  %3102 = vmatprep.mubr.msk.f32.mxu0 (!%p340_p9), %vm3569_vm0, %v3568_v0  ;;  %s4103_s15 = smov (!%p340_p9), 1   ;;  %vm392_vm3 = vcmask (!%p340_p9), 15360   ;;  %v2900_v8 = vld [vmem:[%s4091_s1 + $0x8] sm:$0xff] (!%p340_p9)  ;;  %v2905_v10 = vld [vmem:[%s4091_s1 + $0x10] sm:$0xff] (!%p340_p9)  ;;  %v636_v17 = vld [vmem:[%s4092_s2] sm:$0xff] (!%p340_p9) }
  0x11   : > { %3115 = vmatprep.subr.mxu1 (!%p340_p9), %v3568_v0  ;;  %3117 = vmatprep.mubr.msk.f32.mxu1 (!%p340_p9), %vm3569_vm0, %v3568_v0  ;;  %s4102_s16 = smov (!%p340_p9), 127   ;;  %v3703_v3 = vand.u32 (!%p340_p9), 127, %v386_v2  ;;  %s4105_s13 = smov (!%p340_p9), 126   ;;  %vm641_vm6 = vcmask (!%p340_p9), 64512   ;;  %v2908_v19 = vld [vmem:[%s4092_s2 + $0x8] sm:$0xff] (!%p340_p9)  ;;  %v2912_v21 = vld [vmem:[%s4092_s2 + $0x10] sm:$0xff] (!%p340_p9) }
  0x12   : > { %v876_v26 = vld [vmem:[%s4093_s3] sm:$0xff] (!%p340_p9)  ;;  %s4108_s25 = smov (!%p340_p9), 124   ;;  %v877_v30 = vld [vmem:[%s4093_s3 + $0x8] sm:$0xff] (!%p340_p9)  ;;  %v2915_v31 = vld [vmem:[%s4093_s3 + $0x10] sm:$0xff] (!%p340_p9)  ;;  %vm1156_vm10 = vcmask (!%p340_p9), 130048   ;;  %s3579_s24 = smov (!%p340_p9), 16  }
  0x13   : > { %vm388_vm1 = vcmp.ge.s32.totalorder (!%p340_p9), %v3703_v3, 1  ;;  %vm548_vm4 = vcmp.lt.s32.totalorder (!%p340_p9), %v3703_v3, 31  ;;  %vm637_vm5 = vcmp.ge.s32.totalorder (!%p340_p9), %v3703_v3, 2  ;;  %vm790_vm7 = vcmp.lt.s32.totalorder (!%p340_p9), %v3703_v3, 30  ;;  %v2916_v33 = vld [vmem:[%s4093_s3 + $0x18] sm:$0xff] (!%p340_p9)  ;;  %v2922_v34 = vld [vmem:[%s4093_s3 + $0x20] sm:$0xff] (!%p340_p9) }
  0x14   : > { %vm878_vm8 = vcmp.ge.s32.totalorder (!%p340_p9), %v3703_v3, 4  ;;  %vm1047_vm9 = vcmp.lt.s32.totalorder (!%p340_p9), %v3703_v3, 28  ;;  %v2923_v35 = vld [vmem:[%s4093_s3 + $0x28] sm:$0xff] (!%p340_p9)  ;;  %v1147_v42 = vld [vmem:[%s4094_s4] sm:$0xff] (!%p340_p9)  ;;  %vm1149_vm11 = vcmp.ge.s32.totalorder (!%p340_p9), %v3703_v3, 8  ;;  %vm1322_vm13 = vcmp.lt.s32.totalorder (!%p340_p9), %v3703_v3, 24 }
  0x15   : > { %vm3805_vm12 = vmpackc.low (!%p340_p9), %vm1149_vm11, %vm1149_vm11  ;;  %v1148_v57 = vld [vmem:[%s4094_s4 + $0x8] sm:$0xff] (!%p340_p9)  ;;  %v2927_v58 = vld [vmem:[%s4094_s4 + $0x10] sm:$0xff] (!%p340_p9)  ;;  %vm1431_vm15 = vcmp.lt.s32.totalorder (!%p340_p9), %v3703_v3, 16  ;;  %vm1641_vm11 = vcmp.ge.s32.totalorder (!%p340_p9), %v3703_v3, 16  ;;  %s4122_s12 = smov (!%p340_p9), 124  }
  0x16   : > { %vm3820_vm14 = vmpackc.low (!%p340_p9), %vm1322_vm13, %vm1322_vm13  ;;  %v2928_v61 = vld [vmem:[%s4094_s4 + $0x18] sm:$0xff] (!%p340_p9)  ;;  %v2935_v62 = vld [vmem:[%s4094_s4 + $0x20] sm:$0xff] (!%p340_p9) }
  0x17   : > { %s379_s29 = scalar_select %p378_p10, %s3663_s21, 1  ;;  %v2936_v63 = vld [vmem:[%s4094_s4 + $0x28] sm:$0xff]  ;;  %vm3307_vm13 = vmpackc.low %vm1641_vm11, %vm1641_vm11  ;;  %v2970_v53 = vld [vmem:[%s4097_s7 + $0x18] sm:$0xff] }
  0x19   : > { %s2899_s30 = sshll.u32 %s379_s29, 1  ;;  %s4109_s29 = smov 4  }
  0x1a   : > { %s381_s14 = scalar_lea.vmem %s4114_s0, %s2899_s30  ;;  %s4121_s30 = smov 4  }
  0x1b   : > { %v382_v1 = vld [vmem:[%s381_s14] sm:$0x3]  ;;  %s4106_s14 = smov 2  }
  0x1c   : > { %389 = vrot.lane.b32.xlu0 %v382_v1, %s4103_s15  ;;  %s3576_s15 = smov 120  }
  0x20   : > { %549 = vrot.lane.b32.xlu0 %v382_v1, %s4102_s16 }
  0x8e   : > { %v390_v4 = vpop.permute.xlu0 %389 }
  0x8f   : > { %v391_v6 = vsel %vm388_vm1, %v390_v4, 0.0 }
  0x90   : > { %3101 = vmatpush3.msk.msra.mxu0 %vm396_vm2, %v391_v6 }
  0x91   : > { %3103 = vmatmul.mubr.msk.f32.vlgmr.msra.gmra.mrb[0].mxu0 %vm392_vm3, %v385_v5  ;;  %3105 = vmatprep.subr.mxu0 %v3568_v0 }
  0x92   : > { %3106 = vmatpush3.msk.msra.mxu0 %vm396_vm2, %v382_v1  ;;  %3107 = vmatprep.mubr.msk.f32.mxu0 %vm3569_vm0, %v3568_v0  ;;  %v550_v7 = vpop.permute.xlu0 %549 }
  0x93   : > { %3110 = vmatprep.subr.mxu0 %v3568_v0  ;;  %v551_v9 = vsel %vm548_vm4, %v550_v7, 0.0 }
  0x99   : > { %3108 = vmatmul.mubr.msk.f32.vlgmr.msra.gmra.mrb[0].mxu0 %vm392_vm3, %v2900_v8  ;;  %v2941_v8 = vld [vmem:[%s4095_s5 + $0x20] sm:$0xff] }
  0x9a   : > { %3111 = vmatpush3.msk.msra.mxu0 %vm396_vm2, %v551_v9  ;;  %3112 = vmatprep.mubr.msk.f32.mxu0 %vm3569_vm0, %v3568_v0  ;;  %vm3852_vm2 = vmpackc.low %vm1431_vm15, %vm1431_vm15 }
  0xa1   : > { %3113 = vmatmul.mubr.msk.f32.vlgmr.msra.gmra.mrb[0].mxu0 %vm392_vm3, %v2905_v10  ;;  %vm1654_vm3 = vcmask 261120  }
  0xa2   : > { %3132 = vmatprep.mubr.msk.f32.mxu0 %vm641_vm6, %v876_v26  ;;  %v1425_v26 = vld [vmem:[%s4095_s5 + $0x18] sm:$0xff] }
 0x174   : > { %v624_v11 = vpop.f32.mrb[0].mxu0 }
 0x175   : > { %v629_v12 = vmul.f32 0.2, %v624_v11  ;;  %v3114_v13 = vpop.f32.mrb[1].mxu0 }
 0x177   : > { %v630_v14 = vmax.f32 %v624_v11, %v629_v12 }
 0x179   : > { %631 = vrot.lane.b32.xlu1 %v630_v14, %s4102_s16  ;;  %s3577_s16 = smov 8  }
 0x1eb   : > { %v632_v15 = vpop.permute.xlu1 %631 }
 0x1ec   : > { %v633_v16 = vadd.f32 %v632_v15, %v630_v14 }
 0x1ee   : > { %791 = vrot.lane.b32.xlu0 %v633_v16, %s4105_s13  ;;  %638 = vrot.lane.b32.xlu1 %v633_v16, %s4106_s14  ;;  %s3578_s14 = smov 112  }
 0x260   : > { %v639_v18 = vpop.permute.xlu1 %638  ;;  %v792_v20 = vpop.permute.xlu0 %791 }
 0x261   : > { %3116 = vmatpush3.msk.msra.mxu1 %vm637_vm5, %v639_v18  ;;  %v2978_v18 = vld [vmem:[%s4097_s7 + $0x28] sm:$0xff] }
 0x262   : > { %3118 = vmatmul.mubr.msk.f32.vlgmr.msra.gmra.mrb[0].mxu1 %vm641_vm6, %v636_v17  ;;  %3120 = vmatprep.subr.mxu1 %v3568_v0 }
 0x263   : > { %3121 = vmatpush3.msra.mxu1 %v633_v16  ;;  %3122 = vmatprep.mubr.msk.f32.mxu1 %vm3569_vm0, %v3568_v0 }
 0x264   : > { %3125 = vmatprep.subr.mxu1 %v3568_v0 }
 0x26a   : > { %3123 = vmatmul.mubr.msk.f32.vlgmr.msra.gmra.mrb[0].mxu1 %vm641_vm6, %v2908_v19 }
 0x26b   : > { %3126 = vmatpush3.msk.msra.mxu1 %vm790_vm7, %v792_v20  ;;  %3127 = vmatprep.mubr.msk.f32.mxu1 %vm3569_vm0, %v3568_v0  ;;  %v2942_v20 = vld [vmem:[%s4095_s5 + $0x28] sm:$0xff] }
 0x272   : > { %3128 = vmatmul.mubr.msk.f32.vlgmr.msra.gmra.mrb[0].mxu1 %vm641_vm6, %v2912_v21  ;;  %v2943_v21 = vld [vmem:[%s4095_s5 + $0x30] sm:$0xff] }
 0x273   : > { %3149 = vmatprep.mubr.msk.f32.mxu1 %vm1156_vm10, %v1147_v42 }
 0x345   : > { %v863_v22 = vpop.f32.mrb[0].mxu1 }
 0x346   : > { %v868_v23 = vmul.f32 0.2, %v863_v22  ;;  %v3129_v24 = vpop.f32.mrb[1].mxu1 }
 0x347   : > { %v1423_v24 = vld [vmem:[%s4095_s5 + $0x8] sm:$0xff] }
 0x348   : > { %v869_v25 = vmax.f32 %v863_v22, %v868_v23  ;;  %v2944_v22 = vld [vmem:[%s4095_s5 + $0x38] sm:$0xff]  ;;  %v1422_v23 = vld [vmem:[%s4095_s5] sm:$0xff] }
 0x34a   : > { %870 = vrot.lane.b32.xlu1 %v869_v25, %s4105_s13  ;;  %s375_s13 = sand.u32 1, %s3558_s18  }
 0x34b   : > { %s2898_s22 = sshll.u32 %s375_s13, 1 }
 0x3bc   : > { %v871_v27 = vpop.permute.xlu1 %870 }
 0x3bd   : > { %v872_v28 = vadd.f32 %v871_v27, %v869_v25  ;;  %v1424_v25 = vld [vmem:[%s4095_s5 + $0x10] sm:$0xff] }
 0x3bf   : > { %1048 = vrot.lane.b32.xlu1 %v872_v28, %s4108_s25  ;;  %879 = vrot.lane.b32.xlu0 %v872_v28, %s4109_s29  ;;  %s4123_s29 = smov 2  }
 0x431   : > { %v880_v29 = vpop.permute.xlu0 %879  ;;  %v1049_v32 = vpop.permute.xlu1 %1048 }
 0x432   : > { %3130 = vmatprep.subr.msk.mxu0 %vm878_vm8, %v880_v29 }
 0x433   : > { %3131 = vmatpush3.msk.msra.mxu0 %vm878_vm8, %v880_v29 }
 0x434   : > { %3133 = vmatmul.mubr.msk.f32.vlgmr.msra.gmra.mrb[2].mxu0 %vm641_vm6, %v877_v30  ;;  %3135 = vmatprep.subr.mxu0 %v872_v28 }
 0x435   : > { %3136 = vmatpush3.msra.mxu0 %v872_v28  ;;  %3137 = vmatprep.mubr.msk.f32.mxu0 %vm641_vm6, %v2915_v31 }
 0x436   : > { %3140 = vmatprep.subr.msk.mxu0 %vm1047_vm9, %v1049_v32 }
 0x43c   : > { %3138 = vmatmul.mubr.msk.f32.vlgmr.msra.gmra.mrb[2].mxu0 %vm641_vm6, %v2916_v33 }
 0x43d   : > { %3141 = vmatpush3.msk.msra.mxu0 %vm1047_vm9, %v1049_v32  ;;  %3142 = vmatprep.mubr.msk.f32.mxu0 %vm641_vm6, %v2922_v34  ;;  %v2955_v32 = vld [vmem:[%s4096_s6 + $0x10] sm:$0xff] }
 0x444   : > { %3143 = vmatmul.mubr.msk.f32.vlgmr.msra.gmra.mrb[2].mxu0 %vm641_vm6, %v2923_v35 }
 0x445   : > { %3170 = vmatprep.mubr.msk.f32.mxu0 %vm1156_vm10, %v2941_v8 }
 0x517   : > { %v3144_v36 = vpop.f32.mrb[2].mxu0 }
 0x518   : > { %v1135_v37 = vmul.f32 0.2, %v3144_v36  ;;  %v1123_v38 = vpop.f32.mrb[3].mxu0 }
 0x519   : > { %v1134_v39 = vmul.f32 0.2, %v1123_v38 }
 0x51a   : > { %v1137_v40 = vmax.f32 %v3144_v36, %v1135_v37 }
 0x51b   : > { %v1136_v41 = vmax.f32 %v1123_v38, %v1134_v39 }
 0x51c   : > { %1140 = vrot.lane.b32.xlu1 %v1137_v40, %s4108_s25 }
 0x51d   : > { %1138 = vrot.lane.b32.xlu0 %v1136_v41, %s4108_s25  ;;  %s4126_s25 = smov 127  }
 0x58e   : > { %v1141_v43 = vpop.permute.xlu1 %1140 }
 0x58f   : > { %v1143_v44 = vadd.f32 %v1141_v43, %v1137_v40  ;;  %v1139_v45 = vpop.permute.xlu0 %1138 }
 0x590   : > { %v1142_v46 = vadd.f32 %v1139_v45, %v1136_v41 }
 0x592   : > { %v3452_v47 = vpack.i.bf16 %v1143_v44, %v1142_v46  ;;  %v3286_v48 = vpack.c.bf16 %v1143_v44, %v1142_v46 }
 0x594   : > { %3453 = vrot.lane.b32.xlu1 %v3452_v47, %s3576_s15  ;;  %3448 = vrot.lane.b32.xlu0 %v3452_v47, %s3577_s16 }
 0x606   : > { %v3449_v49 = vpop.permute.xlu0 %3448  ;;  %v3454_v52 = vpop.permute.xlu1 %3453 }
 0x607   : > { %v3451_v50 = vunpack.i.h.bf16 %v3449_v49  ;;  %v3450_v51 = vunpack.i.l.bf16 %v3449_v49  ;;  %v3456_v55 = vunpack.i.h.bf16 %v3454_v52  ;;  %v3455_v56 = vunpack.i.l.bf16 %v3454_v52  ;;  %v1636_v49 = vld [vmem:[%s4096_s6] sm:$0xff] }
 0x609   : > { %v3280_v54 = vpack.c.bf16 %v3451_v50, %v3450_v51  ;;  %v3290_v60 = vpack.c.bf16 %v3456_v55, %v3455_v56  ;;  %v1637_v50 = vld [vmem:[%s4096_s6 + $0x8] sm:$0xff] }
 0x60b   : > { %3282 = vmatprep.subr.msk.bf16.mxu1 %vm3805_vm12, %v3280_v54 }
 0x60c   : > { %3285 = vmatpush3.bf16.msk.msra.mxu1 %vm3805_vm12, %v3280_v54 }
 0x60d   : > { %3287 = vmatprep.subr.bf16.mxu1 %v3286_v48 }
 0x60f   : > { %3150 = vmatmul.mubr.msk.f32.vlgmr.msra.gmra.mrb[2].mxu1 %vm1156_vm10, %v1148_v57 }
 0x610   : > { %3289 = vmatpush3.bf16.msra.mxu1 %v3286_v48  ;;  %3156 = vmatprep.mubr.msk.f32.mxu1 %vm1156_vm10, %v2927_v58  ;;  %v2956_v48 = vld [vmem:[%s4096_s6 + $0x18] sm:$0xff] }
 0x611   : > { %3292 = vmatprep.subr.msk.bf16.mxu1 %vm3820_vm14, %v3290_v60 }
 0x617   : > { %3157 = vmatmul.mubr.msk.f32.vlgmr.msra.gmra.mrb[2].mxu1 %vm1156_vm10, %v2928_v61  ;;  %v1832_v61 = vld [vmem:[%s4097_s7] sm:$0xff] }
 0x618   : > { %3295 = vmatpush3.bf16.msk.msra.mxu1 %vm3820_vm14, %v3290_v60  ;;  %3163 = vmatprep.mubr.msk.f32.mxu1 %vm1156_vm10, %v2935_v62  ;;  %v1821_v60 = vand.u32 8, %v3703_v3 }
 0x61f   : > { %3164 = vmatmul.mubr.msk.f32.vlgmr.msra.gmra.mrb[2].mxu1 %vm1156_vm10, %v2936_v63 }
 0x620   : > { %3194 = vmatprep.mubr.msk.f32.mxu1 %vm1654_vm3, %v2955_v32 }
 0x6f2   : > { %v3165_v1 = vpop.f32.mrb[2].mxu1 }
 0x6f3   : > { %v1413_v2 = vmul.f32 0.2, %v3165_v1  ;;  %v1401_v4 = vpop.f32.mrb[3].mxu1 }
 0x6f4   : > { %v1412_v5 = vmul.f32 0.2, %v1401_v4 }
 0x6f5   : > { %v1415_v6 = vmax.f32 %v3165_v1, %v1413_v2 }
 0x6f6   : > { %v1414_v7 = vmax.f32 %v1401_v4, %v1412_v5 }
 0x6f7   : > { %1418 = vrot.lane.b32.xlu1 %v1415_v6, %s3576_s15 }
 0x6f8   : > { %1416 = vrot.lane.b32.xlu0 %v1414_v7, %s3576_s15 }
 0x769   : > { %v1419_v9 = vpop.permute.xlu1 %1418 }
 0x76a   : > { %v1421_v10 = vadd.f32 %v1419_v9, %v1415_v6  ;;  %v1417_v11 = vpop.permute.xlu0 %1416 }
 0x76b   : > { %v1420_v12 = vadd.f32 %v1417_v11, %v1414_v7 }
 0x76d   : > { %v3457_v13 = vpack.i.bf16 %v1421_v10, %v1420_v12  ;;  %v3302_v14 = vpack.c.bf16 %v1421_v10, %v1420_v12 }
 0x76f   : > { %3458 = vrot.lane.b32.xlu0 %v3457_v13, %s3578_s14  ;;  %s4125_s14 = smov 1  }
 0x7e1   : > { %v3459_v15 = vpop.permute.xlu0 %3458 }
 0x7e2   : > { %v3461_v16 = vunpack.i.h.bf16 %v3459_v15  ;;  %v3460_v17 = vunpack.i.l.bf16 %v3459_v15  ;;  %v2969_v15 = vld [vmem:[%s4097_s7 + $0x10] sm:$0xff] }
 0x7e4   : > { %v3296_v19 = vpack.c.bf16 %v3461_v16, %v3460_v17  ;;  %v2977_v17 = vld [vmem:[%s4097_s7 + $0x20] sm:$0xff] }
 0x7e6   : > { %3298 = vmatprep.subr.msk.bf16.mxu0 %vm3852_vm2, %v3296_v19 }
 0x7e7   : > { %3301 = vmatpush3.bf16.msk.msra.mxu0 %vm3852_vm2, %v3296_v19 }
 0x7e8   : > { %3303 = vmatprep.subr.bf16.mxu0 %v3302_v14 }
 0x7ea   : > { %3171 = vmatmul.mubr.msk.f32.vlgmr.msra.gmra.mrb[4].mxu0 %vm1156_vm10, %v2942_v20 }
 0x7eb   : > { %3305 = vmatpush3.bf16.msra.mxu0 %v3302_v14  ;;  %3173 = vmatprep.mubr.msk.f32.mxu0 %vm1156_vm10, %v2943_v21  ;;  %v1833_v14 = vld [vmem:[%s4097_s7 + $0x8] sm:$0xff] }
 0x7ee   : > { %3174 = vmatmul.mubr.msk.f32.gmra.mrb[6].mxu0 %vm1156_vm10, %v2944_v22 }
 0x7ef   : > { %3180 = vmatprep.mubr.msk.f32.mxu0 %vm1156_vm10, %v1422_v23 }
 0x7f2   : > { %3181 = vmatmul.mubr.msk.f32.vlgmr.msra.gmra.mrb[4].mxu0 %vm1156_vm10, %v1423_v24 }
 0x7f3   : > { %3183 = vmatprep.mubr.msk.f32.mxu0 %vm1156_vm10, %v1424_v25  ;;  %v2098_v25 = vand.u32 4, %v3703_v3 }
 0x7f6   : > { %3184 = vmatmul.mubr.msk.f32.gmra.mrb[6].mxu0 %vm1156_vm10, %v1425_v26  ;;  %v3580_v26 = vmov 0.0|0.0  }
 0x7f7   : > { %3212 = vmatprep.mubr.msk.f32.mxu0 %vm1156_vm10, %v1832_v61 }
 0x8c5   : > { %v3182_v27 = vpop.f32.mrb[4].mxu0 }
 0x8c6   : > { %v1633_v28 = vsel %vm1431_vm15, %v3182_v27, 0.0  ;;  %v1613_v29 = vpop.f32.mrb[5].mxu0 }
 0x8c7   : > { %v1632_v30 = vsel %vm1431_vm15, %v1613_v29, 0.0  ;;  %v3318_v31 = vpack.c.bf16 %v3182_v27, %v1613_v29 }
 0x8c8   : > { %v3462_v33 = vpack.i.bf16 %v1633_v28, %v1632_v30 }
 0x8c9   : > { %v3185_v34 = vpop.f32.mrb[6].mxu0 }
 0x8ca   : > { %v1635_v35 = vsel %vm1431_vm15, %v3185_v34, 0.0  ;;  %3463 = vrot.lane.b32.xlu1 %v3462_v33, %s3579_s24  ;;  %v1623_v36 = vpop.f32.mrb[7].mxu0 }
 0x8cb   : > { %v1634_v37 = vsel %vm1431_vm15, %v1623_v36, 0.0  ;;  %v3324_v38 = vpack.c.bf16 %v3185_v34, %v1623_v36  ;;  %vm1822_vm15 = vcmp.ne.s32.totalorder %v1821_v60, 0 }
 0x8cc   : > { %v3467_v39 = vpack.i.bf16 %v1635_v35, %v1634_v37 }
 0x8ce   : > { %3468 = vrot.lane.b32.xlu0 %v3467_v39, %s3579_s24  ;;  %s4124_s24 = smov 126  }
 0x93c   : > { %v3464_v40 = vpop.permute.xlu1 %3463 }
 0x93d   : > { %v3466_v41 = vunpack.i.h.bf16 %v3464_v40  ;;  %v3465_v42 = vunpack.i.l.bf16 %v3464_v40 }
 0x93f   : > { %v3306_v43 = vpack.c.bf16 %v3466_v41, %v3465_v42  ;;  %v2983_v42 = vld [vmem:[%s4098_s8 + $0x8] sm:$0xff] }
 0x940   : > { %v3469_v44 = vpop.permute.xlu0 %3468 }
 0x941   : > { %v3471_v45 = vunpack.i.h.bf16 %v3469_v44  ;;  %v3470_v46 = vunpack.i.l.bf16 %v3469_v44  ;;  %3308 = vmatprep.subr.msk.bf16.mxu1 %vm3307_vm13, %v3306_v43  ;;  %v2988_v44 = vld [vmem:[%s4098_s8 + $0x10] sm:$0xff] }
 0x942   : > { %3311 = vmatpush3.bf16.msk.msra.mxu1 %vm3307_vm13, %v3306_v43 }
 0x943   : > { %v3312_v47 = vpack.c.bf16 %v3471_v45, %v3470_v46 }
 0x945   : > { %3314 = vmatprep.subr.msk.bf16.mxu1 %vm3307_vm13, %v3312_v47 }
 0x946   : > { %3317 = vmatpush3.bf16.msk.msra.mxu1 %vm3307_vm13, %v3312_v47 }
 0x947   : > { %3320 = vmatprep.subr.msk.bf16.mxu1 %vm3852_vm2, %v3318_v31 }
 0x949   : > { %3195 = vmatmul.mubr.msk.f32.vlgmr.msra.gmra.mrb[4].mxu1 %vm1654_vm3, %v2956_v48 }
 0x94a   : > { %3323 = vmatpush3.bf16.msk.msra.mxu1 %vm3852_vm2, %v3318_v31  ;;  %3205 = vmatprep.mubr.msk.f32.mxu1 %vm1654_vm3, %v1636_v49  ;;  %v2345_v49 = vand.u32 2, %v3703_v3 }
 0x94b   : > { %3326 = vmatprep.subr.msk.bf16.mxu1 %vm3852_vm2, %v3324_v38 }
 0x94e   : > { %3329 = vmatpush3.bf16.msk.msra.mxu1 %vm3852_vm2, %v3324_v38  ;;  %v2108_v38 = vld [vmem:[%s4098_s8] sm:$0xff] }
 0x94f   : > { %3346 = vmatprep.subr.bf16.mxu1 %v3580_v26 }
 0x951   : > { %3206 = vmatmul.mubr.msk.f32.vlgmr.msra.gmra.mrb[4].mxu1 %vm1654_vm3, %v1637_v50 }
 0x952   : > { %3233 = vmatprep.mubr.msk.f32.mxu1 %vm3569_vm0, %v3568_v0 }
 0xa24   : > { %v3207_v51 = vpop.f32.mrb[4].mxu1 }
 0xa25   : > { %v1818_v52 = vmul.f32 0.2, %v3207_v51  ;;  %v1808_v54 = vpop.f32.mrb[5].mxu1 }
 0xa26   : > { %v1817_v55 = vmul.f32 0.2, %v1808_v54 }
 0xa27   : > { %v1820_v56 = vmax.f32 %v3207_v51, %v1818_v52  ;;  %v2352_v52 = vld [vmem:[%s4099_s9] sm:$0xff] }
 0xa28   : > { %v1819_v57 = vmax.f32 %v1808_v54, %v1817_v55  ;;  %v2992_v55 = vld [vmem:[%s4099_s9 + $0x8] sm:$0xff] }
 0xa2a   : > { %v3472_v58 = vpack.i.bf16 %v1820_v56, %v1819_v57 }
 0xa2c   : > { %3473 = vrot.lane.b32.xlu1 %v3472_v58, %s3577_s16 }
 0xa9e   : > { %v3474_v62 = vpop.permute.xlu1 %3473 }
 0xa9f   : > { %v3476_v63 = vunpack.i.h.bf16 %v3474_v62  ;;  %v3475_v1 = vunpack.i.l.bf16 %v3474_v62 }
 0xaa1   : > { %v1827_v2 = vsel %vm1822_vm15, %v3475_v1, %v1819_v57  ;;  %v1828_v4 = vsel %vm1822_vm15, %v3476_v63, %v1820_v56  ;;  %v2996_v57 = vld [vmem:[%s4099_s9 + $0x10] sm:$0xff]  ;;  %v2583_v63 = vand.u32 1, %v3703_v3 }
 0xaa2   : > { %v3482_v5 = vpack.i.bf16 %v1828_v4, %v1827_v2  ;;  %v3336_v6 = vpack.c.bf16 %v1828_v4, %v1827_v2  ;;  %v2590_v4 = vld [vmem:[%s4100_s10] sm:$0x3] }
 0xaa4   : > { %3483 = vrot.lane.b32.xlu1 %v3482_v5, %s3576_s15  ;;  %3478 = vrot.lane.b32.xlu0 %v3482_v5, %s3577_s16  ;;  %s2822_s15 = scalar_lea.sflag [#allocation3], %s375_s13 }
 0xb16   : > { %v3479_v7 = vpop.permute.xlu0 %3478  ;;  %v3484_v10 = vpop.permute.xlu1 %3483 }
 0xb17   : > { %v3481_v8 = vunpack.i.h.bf16 %v3479_v7  ;;  %v3480_v9 = vunpack.i.l.bf16 %v3479_v7  ;;  %v3486_v12 = vunpack.i.h.bf16 %v3484_v10  ;;  %v3485_v13 = vunpack.i.l.bf16 %v3484_v10 }
 0xb19   : > { %v3330_v11 = vpack.c.bf16 %v3481_v8, %v3480_v9  ;;  %v3340_v16 = vpack.c.bf16 %v3486_v12, %v3485_v13  ;;  %v3003_v8 = vld [vmem:[%s4100_s10 + $0x4] sm:$0x3] }
 0xb1b   : > { %3332 = vmatprep.subr.msk.bf16.mxu0 %vm3805_vm12, %v3330_v11 }
 0xb1c   : > { %3335 = vmatpush3.bf16.msk.msra.mxu0 %vm3805_vm12, %v3330_v11  ;;  %vm2099_vm12 = vcmp.ne.s32.totalorder %v2098_v25, 0 }
 0xb1d   : > { %3337 = vmatprep.subr.bf16.mxu0 %v3336_v6 }
 0xb1f   : > { %3213 = vmatmul.mubr.msk.f32.vlgmr.msra.gmra.mrb[8].mxu0 %vm1156_vm10, %v1833_v14 }
 0xb20   : > { %3339 = vmatpush3.bf16.msra.mxu0 %v3336_v6  ;;  %3219 = vmatprep.mubr.msk.f32.mxu0 %vm1156_vm10, %v2969_v15  ;;  %v2999_v6 = vld [vmem:[%s4100_s10 + $0x2] sm:$0x3] }
 0xb21   : > { %3342 = vmatprep.subr.msk.bf16.mxu0 %vm3820_vm14, %v3340_v16 }
 0xb27   : > { %3220 = vmatmul.mubr.msk.f32.vlgmr.msra.gmra.mrb[8].mxu0 %vm1156_vm10, %v2970_v53 }
 0xb28   : > { %3345 = vmatpush3.bf16.msk.msra.mxu0 %vm3820_vm14, %v3340_v16  ;;  %3226 = vmatprep.mubr.msk.f32.mxu0 %vm1156_vm10, %v2977_v17  ;;  %vm3348_vm14 = vmpackc.low %vm878_vm8, %vm878_vm8 }
 0xb29   : > { %3250 = vmatprep.subr.mxu0 %v3568_v0  ;;  %vm3355_vm8 = vmpackc.low %vm1047_vm9, %vm1047_vm9  ;;  %vm2346_vm9 = vcmp.ne.s32.totalorder %v2345_v49, 0 }
 0xb2f   : > { %3227 = vmatmul.mubr.msk.f32.vlgmr.msra.gmra.mrb[8].mxu0 %vm1156_vm10, %v2978_v18 }
 0xb30   : > { %3252 = vmatprep.mubr.msk.f32.mxu0 %vm3569_vm0, %v3568_v0 }
 0xc02   : > { %v3228_v19 = vpop.f32.mrb[8].mxu0 }
 0xc03   : > { %v2095_v20 = vmul.f32 0.2, %v3228_v19  ;;  %v2083_v21 = vpop.f32.mrb[9].mxu0 }
 0xc04   : > { %v2094_v22 = vmul.f32 0.2, %v2083_v21 }
 0xc05   : > { %v2097_v23 = vmax.f32 %v3228_v19, %v2095_v20 }
 0xc06   : > { %v2096_v59 = vmax.f32 %v2083_v21, %v2094_v22 }
 0xc08   : > { %v3487_v24 = vpack.i.bf16 %v2097_v23, %v2096_v59 }
 0xc0a   : > { %3488 = vrot.lane.b32.xlu0 %v3487_v24, %s4121_s30 }
 0xc7c   : > { %v3489_v27 = vpop.permute.xlu0 %3488 }
 0xc7d   : > { %v3491_v28 = vunpack.i.h.bf16 %v3489_v27  ;;  %v3490_v29 = vunpack.i.l.bf16 %v3489_v27 }
 0xc7f   : > { %v2104_v30 = vsel %vm2099_vm12, %v3490_v29, %v2096_v59  ;;  %v2105_v31 = vsel %vm2099_vm12, %v3491_v28, %v2097_v23 }
 0xc80   : > { %v3497_v32 = vpack.i.bf16 %v2105_v31, %v2104_v30  ;;  %v3351_v33 = vpack.c.bf16 %v2105_v31, %v2104_v30 }
 0xc82   : > { %3498 = vrot.lane.b32.xlu0 %v3497_v32, %s4122_s12  ;;  %3493 = vrot.lane.b32.xlu1 %v3497_v32, %s4121_s30 }
 0xcf4   : > { %v3494_v34 = vpop.permute.xlu1 %3493  ;;  %v3499_v39 = vpop.permute.xlu0 %3498 }
 0xcf5   : > { %v3496_v35 = vunpack.i.h.bf16 %v3494_v34  ;;  %v3495_v36 = vunpack.i.l.bf16 %v3494_v34  ;;  %v3501_v40 = vunpack.i.h.bf16 %v3499_v39  ;;  %v3500_v41 = vunpack.i.l.bf16 %v3499_v39 }
 0xcf7   : > { %v3347_v37 = vpack.c.bf16 %v3496_v35, %v3495_v36  ;;  %v3354_v43 = vpack.c.bf16 %v3501_v40, %v3500_v41 }
 0xcf9   : > { %3349 = vmatpush3.bf16.msk.msra.mxu1 %vm3348_vm14, %v3347_v37 }
 0xcfa   : > { %3350 = vmatprep.subr.bf16.mxu1 %v3580_v26 }
 0xcfc   : > { %3234 = vmatmul.mubr.msk.f32.vlgmr.msra.gmra.mrb[6].mxu1 %vm1156_vm10, %v2108_v38 }
 0xcfd   : > { %3352 = vmatpush3.bf16.msra.mxu1 %v3351_v33  ;;  %3240 = vmatprep.mubr.msk.f32.mxu1 %vm3569_vm0, %v3568_v0 }
 0xcfe   : > { %3353 = vmatprep.subr.bf16.mxu1 %v3580_v26 }
 0xd04   : > { %3241 = vmatmul.mubr.msk.f32.vlgmr.msra.gmra.mrb[6].mxu1 %vm1156_vm10, %v2983_v42 }
 0xd05   : > { %3356 = vmatpush3.bf16.msk.msra.mxu1 %vm3355_vm8, %v3354_v43  ;;  %3247 = vmatprep.mubr.msk.f32.mxu1 %vm3569_vm0, %v3568_v0 }
 0xd06   : > { %3265 = vmatprep.subr.mxu1 %v3568_v0 }
 0xd0c   : > { %3248 = vmatmul.mubr.msk.f32.vlgmr.msra.gmra.mrb[6].mxu1 %vm1156_vm10, %v2988_v44 }
 0xd0d   : > { %3267 = vmatprep.mubr.msk.f32.mxu1 %vm3569_vm0, %v3568_v0 }
 0xddf   : > { %v2338_v45 = vpop.f32.mrb[6].mxu1 }
 0xde0   : > { %v2343_v46 = vmul.f32 0.2, %v2338_v45  ;;  %v3249_v47 = vpop.f32.mrb[7].mxu1 }
 0xde2   : > { %v2344_v48 = vmax.f32 %v2338_v45, %v2343_v46 }
 0xde4   : > { %2347 = vrot.lane.b32.xlu1 %v2344_v48, %s4123_s29 }
 0xe56   : > { %v2348_v50 = vpop.permute.xlu1 %2347 }
 0xe57   : > { %v2349_v51 = vsel %vm2346_vm9, %v2348_v50, %v2344_v48 }
 0xe58   : > { %2504 = vrot.lane.b32.xlu1 %v2349_v51, %s4124_s24  ;;  %2353 = vrot.lane.b32.xlu0 %v2349_v51, %s4123_s29 }
 0xeca   : > { %v2354_v54 = vpop.permute.xlu0 %2353  ;;  %v2505_v56 = vpop.permute.xlu1 %2504 }
 0xecb   : > { %3251 = vmatpush3.msk.msra.mxu0 %vm637_vm5, %v2354_v54  ;;  %vm2584_vm5 = vcmp.ne.s32.totalorder %v2583_v63, 0 }
 0xecc   : > { %3253 = vmatmul.mubr.msk.f32.vlgmr.msra.gmra.mrb[10].mxu0 %vm641_vm6, %v2352_v52  ;;  %3255 = vmatprep.subr.mxu0 %v3568_v0 }
 0xecd   : > { %3256 = vmatpush3.msra.mxu0 %v2349_v51  ;;  %3257 = vmatprep.mubr.msk.f32.mxu0 %vm3569_vm0, %v3568_v0 }
 0xece   : > { %3260 = vmatprep.subr.mxu0 %v3568_v0 }
 0xed4   : > { %3258 = vmatmul.mubr.msk.f32.vlgmr.msra.gmra.mrb[10].mxu0 %vm641_vm6, %v2992_v55 }
 0xed5   : > { %3261 = vmatpush3.msk.msra.mxu0 %vm790_vm7, %v2505_v56  ;;  %3262 = vmatprep.mubr.msk.f32.mxu0 %vm3569_vm0, %v3568_v0 }
 0xedc   : > { %3263 = vmatmul.mubr.msk.f32.vlgmr.msra.gmra.mrb[10].mxu0 %vm641_vm6, %v2996_v57 }
 0xfaf   : > { %v2576_v58 = vpop.f32.mrb[10].mxu0 }
 0xfb0   : > { %v2581_v60 = vmul.f32 0.2, %v2576_v58  ;;  %v3264_v61 = vpop.f32.mrb[11].mxu0 }
 0xfb2   : > { %v2582_v62 = vmax.f32 %v2576_v58, %v2581_v60 }
 0xfb4   : > { %2585 = vrot.lane.b32.xlu0 %v2582_v62, %s4125_s14 }
0x1026   : > { %v2586_v1 = vpop.permute.xlu0 %2585 }
0x1027   : > { %v2587_v2 = vsel %vm2584_vm5, %v2586_v1, %v2582_v62 }
0x1028   : > { %2742 = vrot.lane.b32.xlu0 %v2587_v2, %s4126_s25  ;;  %2591 = vrot.lane.b32.xlu1 %v2587_v2, %s4125_s14  ;;  %s3007_s14 = sshll.u32 %s3663_s21, 5  ;;  %s377_s25 = scalar_lea.vmem [#allocation2], %s2898_s22 }
0x1029   : > { %s2835_s29 = sshll.u32 %s377_s25, 4  ;;  %s4048_s12 = scalar_lea.hbm %s4101_s11, %s3007_s14  ;;  %s4050_s29 = int_to_ptr.vmem [resolvable:$true] %s2835_s29 }
0x102a   : > { %s3504_s16 = scalar_lea.vmem %s4050_s29, 32  ;;  %s3581_s21 = smov [#allocation2]  }
0x102b   : > { %p3505_p11 = scmp.ne.s32.totalorder %s4050_s29, %s3504_s16  ;;  %s3508_s22 = sshll.u32 %s3581_s21, 4  ;;  %s3509_s22 = int_to_ptr.vmem [resolvable:$false] %s3508_s22 }
0x102c   : > { %s3510_s0 = scalar_lea.vmem %s3509_s22, 64  ;;  %p3511_p0 = scmp.lt.s32.totalorder %s4050_s29, %s3509_s22 }
0x102d   : > { %p3506_p12 = pnand %p3505_p11, %p3680_p5  ;;  %p3512_p1 = scmp.lt.s32.totalorder %s3510_s0, %s3504_s16 }
0x102f   : > { %p3507_p13 = pneg %p3506_p12  ;;  %p3513_p2 = por %p3512_p1, %p3511_p0 }
0x1031   : > { %p3514_p3 = pnand %p3513_p2, %p3507_p13 }
0x109a   : > { %v2592_v5 = vpop.permute.xlu1 %2591  ;;  %v2743_v7 = vpop.permute.xlu0 %2742 }
0x109b   : > { %3266 = vmatpush3.msk.msra.mxu1 %vm388_vm1, %v2592_v5 }
0x109c   : > { %3268 = vmatmul.mubr.msk.f32.vlgmr.msra.gmra.mrb[8].mxu1 %vm641_vm6, %v2590_v4  ;;  %3270 = vmatprep.subr.mxu1 %v3568_v0 }
0x109d   : > { %3271 = vmatpush3.msra.mxu1 %v2587_v2  ;;  %3272 = vmatprep.mubr.msk.f32.mxu1 %vm3569_vm0, %v3568_v0 }
0x109e   : > { %3275 = vmatprep.subr.mxu1 %v3568_v0 }
0x10a4   : > { %3273 = vmatmul.mubr.msk.f32.vlgmr.msra.gmra.mrb[8].mxu1 %vm641_vm6, %v2999_v6 }
0x10a5   : > { %3276 = vmatpush3.msk.msra.mxu1 %vm548_vm4, %v2743_v7  ;;  %3277 = vmatprep.mubr.msk.f32.mxu1 %vm3569_vm0, %v3568_v0 }
0x10ac   : > { %3278 = vmatmul.mubr.msk.f32.vlgmr.msra.gmra.mrb[8].mxu1 %vm641_vm6, %v3003_v8 }
0x117f   : > { %v2814_v9 = vpop.f32.mrb[8].mxu1 }
0x1180   : > { %3502 = vtanh.f32 %v2814_v9  ;;  %v3279_v10 = vpop.f32.mrb[9].mxu1 }
0x118a   : > { %v3503_v0 = vpop.eup %3502 }
0x118b   : > { %2820 = vst [vmem:[%s377_s25] sm:$0x3] %v3503_v0 }
0x118c   : > { %3517 = shalt.err (!%p3514_p3)
}
0x118d   : > { %s3518_s13 = scalar_lea.hbm %s4048_s12, 32  ;;  %s3522_s24 = scalar_lea.hbm %s4101_s11, 64 }
0x118e   : > { %p3519_p4 = scmp.ne.s32.totalorder %s4048_s12, %s3518_s13  ;;  %p3523_p9 = scmp.lt.u32.totalorder %s4048_s12, %s4101_s11 }
0x118f   : > { %p3524_p10 = scmp.lt.u32.totalorder %s3522_s24, %s3518_s13  ;;  %p3526_p12 = scmp.lt.u32.totalorder %s3518_s13, %s4048_s12 }
0x1190   : > { %p3520_p7 = pnand %p3519_p4, %p3680_p5 }
0x1191   : > { %p3525_p11 = por %p3524_p10, %p3523_p9 }
0x1192   : > { %p3521_p8 = pneg %p3520_p7 }
0x1193   : > { %p3527_p13 = por %p3526_p12, %p3525_p11 }
0x1195   : > { %p3528_p0 = pnand %p3527_p13, %p3521_p8 }
0x1197   : > { %3531 = shalt.err (!%p3528_p0)
}
0x1198   : > { %3395 = dma.vmem_to_hbm [thread:$0]  (%p3680_p5), %s4050_s29, 32, %s4048_s12, %s2822_s15  }
0x1199 PF: > { %p3401_p1 = scmp.ge.s32.totalorder %s3566_s20, 2  ;;  %s2847_s0 = sand.u32 1, %s3554_s17  }
0x119a   : > { %s2848_s16 = scalar_lea.sflag [#allocation3], %s2847_s0 }
0x119b   : > { %p3398_p2 = pnand %p3401_p1, %p3684_p6 }
0x119d   : > { %3549 = dma.done.wait (!%p3398_p2), %s2848_s16, 32  }
0x119e   : > { %3551 = vsyncadd (!%p3398_p2), %s2848_s16, 4294967264  ;;  %p21_p3 = scmp.ge.s32.totalorder %s3667_s23, 4   ;;  %s4127_s17 = smov %s3558_s18 }
0x119f   : > { %s4128_s18 = smov %s3562_s19  ;;  %s4129_s19 = smov %s3678_s26 }
0x11a0   : > { %s4130_s20 = smov %s3667_s23  ;;  %23 = sbr.rel (!%p21_p3) target bundleno = 5 (0x5), region = 117 }
0x11a7   :  { %2853 = vsyncpa [#allocation3], 1 }
0x11a8   :  { %2855 = vsyncpa [#allocation3 + $0x1], 1 }

</bundles_post_ra>
